<compile_context>
chip_gen: v7x
topology: tpu7x:2x2x1
jax: 0.10.0
libtpu: 0.0.40
codegen_flags: <defaults>
</compile_context>

<pallas_src>
import functools
import math

import jax
import jax.numpy as jnp
from jax import lax
from jax.experimental import pallas as pl
from jax.experimental.pallas import tpu as pltpu

LN_EPS = 1e-5


# --------------------------- in-kernel helpers (traced) ---------------------------

def _mha_heads(q, k, v, mask, n_heads, scale):
    """Multi-head attention core on one batch element.

    q: (T, E) f32, k/v: (S, E) f32, mask: (T, S) additive f32 -> (T, E) f32.
    Heads are a static Python loop (small, fixed H); MXU dots use bf16 operands with
    f32 accumulation; softmax bookkeeping stays f32, the divide goes to the EUP via
    pl.reciprocal(approx=True).
    """
    T, E = q.shape
    Dh = E // n_heads
    outs = []
    for h in range(n_heads):
        sl = slice(h * Dh, (h + 1) * Dh)
        qh = q[:, sl].astype(jnp.bfloat16)
        kh = k[:, sl].astype(jnp.bfloat16)
        vh = v[:, sl].astype(jnp.bfloat16)
        # q @ k^T without an explicit transpose (contract last dims of both).
        s = lax.dot_general(qh, kh, (((1,), (1,)), ((), ())),
                            preferred_element_type=jnp.float32)
        s = s * scale + mask
        s = s - jnp.max(s, axis=-1, keepdims=True)
        p = jnp.exp(s)
        p = p * pl.reciprocal(jnp.sum(p, axis=-1, keepdims=True), approx=True)
        outs.append(jnp.dot(p.astype(jnp.bfloat16), vh,
                            preferred_element_type=jnp.float32))
    return jnp.concatenate(outs, axis=-1)            # (T, E) f32


def _residual_ln(x, y, gamma, beta, eps):
    """LayerNorm(x + y) in f32. x, y: (T, E); gamma/beta: (1, E)."""
    z = x + y
    mean = jnp.mean(z, axis=-1, keepdims=True)
    zc = z - mean
    var = jnp.mean(zc * zc, axis=-1, keepdims=True)
    zn = zc * lax.rsqrt(var + eps)
    return zn * gamma + beta


# --------------------------------- Pallas kernels ----------------------------------

def _ctx_kv_kernel(ctx_ref, wkv_ref, bkv_ref, k_ref, v_ref):
    """Per batch: [K | V] = ctx @ W_kv + b_kv, stored bf16 (layer-invariant, hoisted)."""
    E = ctx_ref.shape[-1]
    kv = (jnp.dot(ctx_ref[...].astype(jnp.bfloat16), wkv_ref[...],
                  preferred_element_type=jnp.float32)
          + bkv_ref[...])                             # (S, 2E) f32
    k_ref[...] = kv[:, :E].astype(k_ref.dtype)
    v_ref[...] = kv[:, E:].astype(v_ref.dtype)


def _self_attn_block_kernel(x_ref, wqkv_ref, bqkv_ref, wo_ref, bo_ref,
                            mask_ref, g_ref, beta_ref, o_ref,
                            *, n_heads, scale, eps):
    """LN1(x + SelfAttn(x)) for one batch element; fused QKV proj + MHA + out proj."""
    x = x_ref[...].astype(jnp.float32)                # (T, E)
    E = x.shape[-1]
    qkv = (jnp.dot(x.astype(jnp.bfloat16), wqkv_ref[...],
                   preferred_element_type=jnp.float32)
           + bqkv_ref[...])                           # (T, 3E) f32
    q = qkv[:, :E]
    k = qkv[:, E:2 * E]
    v = qkv[:, 2 * E:]
    attn = _mha_heads(q, k, v, mask_ref[...].astype(jnp.float32), n_heads, scale)
    proj = (jnp.dot(attn.astype(jnp.bfloat16), wo_ref[...],
                    preferred_element_type=jnp.float32)
            + bo_ref[...])
    o_ref[...] = _residual_ln(x, proj, g_ref[...], beta_ref[...], eps).astype(o_ref.dtype)


def _cross_attn_block_kernel(x_ref, kctx_ref, vctx_ref, wq_ref, bq_ref,
                             wo_ref, bo_ref, mask_ref, g_ref, beta_ref, o_ref,
                             *, n_heads, scale, eps):
    """LN2(x + CrossAttn(x, K_ctx, V_ctx)) for one batch element (K/V precomputed)."""
    x = x_ref[...].astype(jnp.float32)                # (T, E)
    q = (jnp.dot(x.astype(jnp.bfloat16), wq_ref[...],
                 preferred_element_type=jnp.float32)
         + bq_ref[...])                               # (T, E) f32
    kc = kctx_ref[...].astype(jnp.float32)            # (S, E)
    vc = vctx_ref[...].astype(jnp.float32)
    attn = _mha_heads(q, kc, vc, mask_ref[...].astype(jnp.float32), n_heads, scale)
    proj = (jnp.dot(attn.astype(jnp.bfloat16), wo_ref[...],
                    preferred_element_type=jnp.float32)
            + bo_ref[...])
    o_ref[...] = _residual_ln(x, proj, g_ref[...], beta_ref[...], eps).astype(o_ref.dtype)


def _ffn_block_kernel(x_ref, w1_ref, b1_ref, w2_ref, b2_ref, g_ref, beta_ref, o_ref,
                      *, eps):
    """LN3(x + W2 @ relu(W1 @ x + b1) + b2) for one batch element."""
    x = x_ref[...].astype(jnp.float32)                # (T, E)
    h = (jnp.dot(x.astype(jnp.bfloat16), w1_ref[...],
                 preferred_element_type=jnp.float32)
         + b1_ref[...])
    h = jnp.maximum(h, 0.0)
    ff = (jnp.dot(h.astype(jnp.bfloat16), w2_ref[...],
                  preferred_element_type=jnp.float32)
          + b2_ref[...])
    o_ref[...] = _residual_ln(x, ff, g_ref[...], beta_ref[...], eps).astype(o_ref.dtype)


# ----------------------------------- wrappers ---------------------------------------

def _parallel_params():
    return pltpu.CompilerParams(dimension_semantics=("parallel",))


def context_kv(context, cp):
    """Precompute cross-attention K/V once (layer-invariant): (B,S,E) bf16 each."""
    B, S, E = context.shape
    return pl.pallas_call(
        _ctx_kv_kernel,
        out_shape=(jax.ShapeDtypeStruct((B, S, E), jnp.bfloat16),
                   jax.ShapeDtypeStruct((B, S, E), jnp.bfloat16)),
        grid=(B,),
        in_specs=[
            pl.BlockSpec((None, S, E), lambda b: (b, 0, 0)),
            pl.BlockSpec((E, 2 * E), lambda b: (0, 0)),
            pl.BlockSpec((1, 2 * E), lambda b: (0, 0)),
        ],
        out_specs=(pl.BlockSpec((None, S, E), lambda b: (b, 0, 0)),
                   pl.BlockSpec((None, S, E), lambda b: (b, 0, 0))),
        compiler_params=_parallel_params(),
    )(context, cp["wkv"], cp["bkv"])


def self_attn_block(x, sp, mask, n_heads, eps=LN_EPS):
    B, T, E = x.shape
    scale = 1.0 / math.sqrt(E // n_heads)
    kern = functools.partial(_self_attn_block_kernel,
                             n_heads=n_heads, scale=scale, eps=eps)
    return pl.pallas_call(
        kern,
        out_shape=jax.ShapeDtypeStruct((B, T, E), x.dtype),
        grid=(B,),
        in_specs=[
            pl.BlockSpec((None, T, E), lambda b: (b, 0, 0)),
            pl.BlockSpec((E, 3 * E), lambda b: (0, 0)),
            pl.BlockSpec((1, 3 * E), lambda b: (0, 0)),
            pl.BlockSpec((E, E), lambda b: (0, 0)),
            pl.BlockSpec((1, E), lambda b: (0, 0)),
            pl.BlockSpec((T, T), lambda b: (0, 0)),
            pl.BlockSpec((1, E), lambda b: (0, 0)),
            pl.BlockSpec((1, E), lambda b: (0, 0)),
        ],
        out_specs=pl.BlockSpec((None, T, E), lambda b: (b, 0, 0)),
        compiler_params=_parallel_params(),
    )(x, sp["wqkv"], sp["bqkv"], sp["wo"], sp["bo"], mask, sp["ln_g"], sp["ln_b"])


def cross_attn_block(x, k_ctx, v_ctx, cp, mask, n_heads, eps=LN_EPS):
    B, T, E = x.shape
    S = k_ctx.shape[1]
    scale = 1.0 / math.sqrt(E // n_heads)
    kern = functools.partial(_cross_attn_block_kernel,
                             n_heads=n_heads, scale=scale, eps=eps)
    return pl.pallas_call(
        kern,
        out_shape=jax.ShapeDtypeStruct((B, T, E), x.dtype),
        grid=(B,),
        in_specs=[
            pl.BlockSpec((None, T, E), lambda b: (b, 0, 0)),
            pl.BlockSpec((None, S, E), lambda b: (b, 0, 0)),
            pl.BlockSpec((None, S, E), lambda b: (b, 0, 0)),
            pl.BlockSpec((E, E), lambda b: (0, 0)),
            pl.BlockSpec((1, E), lambda b: (0, 0)),
            pl.BlockSpec((E, E), lambda b: (0, 0)),
            pl.BlockSpec((1, E), lambda b: (0, 0)),
            pl.BlockSpec((T, S), lambda b: (0, 0)),
            pl.BlockSpec((1, E), lambda b: (0, 0)),
            pl.BlockSpec((1, E), lambda b: (0, 0)),
        ],
        out_specs=pl.BlockSpec((None, T, E), lambda b: (b, 0, 0)),
        compiler_params=_parallel_params(),
    )(x, k_ctx, v_ctx, cp["wq"], cp["bq"], cp["wo"], cp["bo"],
      mask, cp["ln_g"], cp["ln_b"])


def ffn_block(x, fp, eps=LN_EPS):
    B, T, E = x.shape
    FF = fp["w1"].shape[1]
    kern = functools.partial(_ffn_block_kernel, eps=eps)
    return pl.pallas_call(
        kern,
        out_shape=jax.ShapeDtypeStruct((B, T, E), x.dtype),
        grid=(B,),
        in_specs=[
            pl.BlockSpec((None, T, E), lambda b: (b, 0, 0)),
            pl.BlockSpec((E, FF), lambda b: (0, 0)),
            pl.BlockSpec((1, FF), lambda b: (0, 0)),
            pl.BlockSpec((FF, E), lambda b: (0, 0)),
            pl.BlockSpec((1, E), lambda b: (0, 0)),
            pl.BlockSpec((1, E), lambda b: (0, 0)),
            pl.BlockSpec((1, E), lambda b: (0, 0)),
        ],
        out_specs=pl.BlockSpec((None, T, E), lambda b: (b, 0, 0)),
        compiler_params=_parallel_params(),
    )(x, fp["w1"], fp["b1"], fp["w2"], fp["b2"], fp["ln_g"], fp["ln_b"])


# --------------------------- parameter handling / driver ----------------------------

def init_layer_params(key, d_model, dim_ff):
    """Raw per-projection weights (PyTorch-style: one layer, deep-copied across N)."""
    def dense(k, fan_in, fan_out):
        return 0.02 * jax.random.normal(k, (fan_in, fan_out), jnp.float32)

    keys = jax.random.split(key, 10)

    def attn_params(ks):
        return {
            "wq": dense(ks[0], d_model, d_model), "bq": jnp.zeros((d_model,), jnp.float32),
            "wk": dense(ks[1], d_model, d_model), "bk": jnp.zeros((d_model,), jnp.float32),
            "wv": dense(ks[2], d_model, d_model), "bv": jnp.zeros((d_model,), jnp.float32),
            "wo": dense(ks[3], d_model, d_model), "bo": jnp.zeros((d_model,), jnp.float32),
        }

    return {
        "self_attn": attn_params(keys[0:4]),
        "cross_attn": attn_params(keys[4:8]),
        "w1": dense(keys[8], d_model, dim_ff), "b1": jnp.zeros((dim_ff,), jnp.float32),
        "w2": dense(keys[9], dim_ff, d_model), "b2": jnp.zeros((d_model,), jnp.float32),
        "ln1_g": jnp.ones((d_model,), jnp.float32), "ln1_b": jnp.zeros((d_model,), jnp.float32),
        "ln2_g": jnp.ones((d_model,), jnp.float32), "ln2_b": jnp.zeros((d_model,), jnp.float32),
        "ln3_g": jnp.ones((d_model,), jnp.float32), "ln3_b": jnp.zeros((d_model,), jnp.float32),
    }


def fuse_layer_params(p):
    """Fuse QKV / KV weights, cast matmul weights to bf16, keep biases/LN params f32."""
    sa, ca = p["self_attn"], p["cross_attn"]
    w = lambda a: a.astype(jnp.bfloat16)
    row = lambda b: b.reshape(1, -1).astype(jnp.float32)
    return {
        "self": {
            "wqkv": w(jnp.concatenate([sa["wq"], sa["wk"], sa["wv"]], axis=1)),
            "bqkv": row(jnp.concatenate([sa["bq"], sa["bk"], sa["bv"]])),
            "wo": w(sa["wo"]), "bo": row(sa["bo"]),
            "ln_g": row(p["ln1_g"]), "ln_b": row(p["ln1_b"]),
        },
        "cross": {
            "wq": w(ca["wq"]), "bq": row(ca["bq"]),
            "wkv": w(jnp.concatenate([ca["wk"], ca["wv"]], axis=1)),
            "bkv": row(jnp.concatenate([ca["bk"], ca["bv"]])),
            "wo": w(ca["wo"]), "bo": row(ca["bo"]),
            "ln_g": row(p["ln2_g"]), "ln_b": row(p["ln2_b"]),
        },
        "ffn": {
            "w1": w(p["w1"]), "b1": row(p["b1"]),
            "w2": w(p["w2"]), "b2": row(p["b2"]),
            "ln_g": row(p["ln3_g"]), "ln_b": row(p["ln3_b"]),
        },
    }


def transformer_decoder(x, context, layer_params, n_layers, n_heads,
                        target_attn_mask=None, context_attn_mask=None):
    B, T, E = x.shape
    S = context.shape[1]
    if target_attn_mask is None:
        target_attn_mask = jnp.zeros((T, T), jnp.float32)
    if context_attn_mask is None:
        context_attn_mask = jnp.zeros((T, S), jnp.float32)
    target_attn_mask = target_attn_mask.astype(jnp.float32)
    context_attn_mask = context_attn_mask.astype(jnp.float32)

    fp = fuse_layer_params(layer_params)
    # All layers share identical (deep-copied) weights and `context` never changes,
    # so the cross-attention K/V projection is computed once and reused by every layer.
    k_ctx, v_ctx = context_kv(context, fp["cross"])

    for _ in range(n_layers):
        x = self_attn_block(x, fp["self"], target_attn_mask, n_heads)
        x = cross_attn_block(x, k_ctx, v_ctx, fp["cross"], context_attn_mask, n_heads)
        x = ffn_block(x, fp["ffn"])
    return x


if __name__ == "__main__":
    B, T, S, E, H, FF, N_LAYERS = 2, 8, 8, 32, 4, 64, 2

    key = jax.random.PRNGKey(0)
    k_x, k_ctx, k_p = jax.random.split(key, 3)
    x = jax.random.normal(k_x, (B, T, E), jnp.float32)          # decoder input
    context = jax.random.normal(k_ctx, (B, S, E), jnp.float32)  # encoder memory
    params = init_layer_params(k_p, E, FF)

    # Causal additive target mask; no context mask (None -> zeros).
    causal = jnp.where(jnp.tril(jnp.ones((T, T), jnp.bool_)), 0.0, -1e9).astype(jnp.float32)

    fwd = jax.jit(functools.partial(transformer_decoder, n_layers=N_LAYERS, n_heads=H))
    out = fwd(x, context, params, target_attn_mask=causal)
    out = jax.block_until_ready(out)

    assert out.shape == (B, T, E) and bool(jnp.all(jnp.isfinite(out)))
    print("KERNEL_OK")
</pallas_src>

<mosaic_0001>
module attributes {stable_mosaic.version = 11 : i64} {
  func.func @_ctx_kv_kernel(%arg0: i32, %arg1: memref<1x8x32xf32, #tpu.memory_space<vmem>>, %arg2: memref<32x64xbf16, #tpu.memory_space<vmem>>, %arg3: memref<1x64xf32, #tpu.memory_space<vmem>>, %arg4: memref<1x8x32xbf16, #tpu.memory_space<vmem>>, %arg5: memref<1x8x32xbf16, #tpu.memory_space<vmem>>) attributes {dimension_semantics = [#tpu.dimension_semantics<parallel>], iteration_bounds = array<i64: 2>, scalar_prefetch = 0 : i64, scratch_operands = 0 : i64, tpu.core_type = #tpu.core_type<tc>, window_params = [{transform_indices = @transform_0, window_bounds = array<i64: 1, 8, 32>}, {pipeline_mode = #tpu.pipeline_mode<synchronous>, transform_indices = @transform_1, window_bounds = array<i64: 32, 64>}, {pipeline_mode = #tpu.pipeline_mode<synchronous>, transform_indices = @transform_2, window_bounds = array<i64: 1, 64>}, {transform_indices = @transform_3, window_bounds = array<i64: 1, 8, 32>}, {transform_indices = @transform_4, window_bounds = array<i64: 1, 8, 32>}]} {
    %c0 = arith.constant 0 : index
    %c0_0 = arith.constant 0 : index
    %c0_1 = arith.constant 0 : index
    %0 = vector.load %arg1[%c0, %c0_0, %c0_1] : memref<1x8x32xf32, #tpu.memory_space<vmem>>, vector<1x8x32xf32>
    %1 = vector.shape_cast %0 : vector<1x8x32xf32> to vector<8x32xf32>
    %2 = arith.truncf %1 : vector<8x32xf32> to vector<8x32xbf16>
    %c0_2 = arith.constant 0 : index
    %c0_3 = arith.constant 0 : index
    %3 = vector.load %arg2[%c0_2, %c0_3] : memref<32x64xbf16, #tpu.memory_space<vmem>>, vector<32x64xbf16>
    %cst = arith.constant dense<0.000000e+00> : vector<8x64xf32>
    %4 = tpu.matmul %2, %3, %cst {dimension_numbers = #tpu.dot_dimension_numbers<[1], [0], [0], [1], [0, 0, 1, 1], [], []>} : vector<8x32xbf16>, vector<32x64xbf16>, vector<8x64xf32> -> vector<8x64xf32>
    %c0_4 = arith.constant 0 : index
    %c0_5 = arith.constant 0 : index
    %5 = vector.load %arg3[%c0_4, %c0_5] : memref<1x64xf32, #tpu.memory_space<vmem>>, vector<1x64xf32>
    %6 = vector.broadcast %5 : vector<1x64xf32> to vector<8x64xf32>
    %7 = arith.addf %4, %6 : vector<8x64xf32>
    %8 = vector.extract_strided_slice %7 {offsets = [0, 0], sizes = [8, 32], strides = [1, 1]} : vector<8x64xf32> to vector<8x32xf32>
    %9 = arith.truncf %8 : vector<8x32xf32> to vector<8x32xbf16>
    %c0_6 = arith.constant 0 : index
    %c0_7 = arith.constant 0 : index
    %c0_8 = arith.constant 0 : index
    %10 = vector.load %arg4[%c0_6, %c0_7, %c0_8] : memref<1x8x32xbf16, #tpu.memory_space<vmem>>, vector<1x8x32xbf16>
    %11 = vector.shape_cast %10 : vector<1x8x32xbf16> to vector<8x32xbf16>
    %12 = vector.shape_cast %9 : vector<8x32xbf16> to vector<1x8x32xbf16>
    tpu.vector_store %arg4[%c0_6, %c0_7, %c0_8], %12 {strides = array<i32>} : memref<1x8x32xbf16, #tpu.memory_space<vmem>>, vector<1x8x32xbf16>,
    %13 = vector.extract_strided_slice %7 {offsets = [0, 32], sizes = [8, 32], strides = [1, 1]} : vector<8x64xf32> to vector<8x32xf32>
    %14 = arith.truncf %13 : vector<8x32xf32> to vector<8x32xbf16>
    %c0_9 = arith.constant 0 : index
    %c0_10 = arith.constant 0 : index
    %c0_11 = arith.constant 0 : index
    %15 = vector.load %arg5[%c0_9, %c0_10, %c0_11] : memref<1x8x32xbf16, #tpu.memory_space<vmem>>, vector<1x8x32xbf16>
    %16 = vector.shape_cast %15 : vector<1x8x32xbf16> to vector<8x32xbf16>
    %17 = vector.shape_cast %14 : vector<8x32xbf16> to vector<1x8x32xbf16>
    tpu.vector_store %arg5[%c0_9, %c0_10, %c0_11], %17 {strides = array<i32>} : memref<1x8x32xbf16, #tpu.memory_space<vmem>>, vector<1x8x32xbf16>,
    return
  }
  func.func @transform_0(%arg0: i32) -> (i32, i32, i32) {
    %c0_i32 = arith.constant 0 : i32
    %c0_i32_0 = arith.constant 0 : i32
    %c0_i32_1 = arith.constant 0 : i32
    return %arg0, %c0_i32, %c0_i32_0 : i32, i32, i32
  }
  func.func @transform_1(%arg0: i32) -> (i32, i32) {
    %c0_i32 = arith.constant 0 : i32
    %c0_i32_0 = arith.constant 0 : i32
    %c0_i32_1 = arith.constant 0 : i32
    return %c0_i32, %c0_i32_0 : i32, i32
  }
  func.func @transform_2(%arg0: i32) -> (i32, i32) {
    %c0_i32 = arith.constant 0 : i32
    %c0_i32_0 = arith.constant 0 : i32
    %c0_i32_1 = arith.constant 0 : i32
    return %c0_i32, %c0_i32_0 : i32, i32
  }
  func.func @transform_3(%arg0: i32) -> (i32, i32, i32) {
    %c0_i32 = arith.constant 0 : i32
    %c0_i32_0 = arith.constant 0 : i32
    %c0_i32_1 = arith.constant 0 : i32
    return %arg0, %c0_i32, %c0_i32_0 : i32, i32, i32
  }
  func.func @transform_4(%arg0: i32) -> (i32, i32, i32) {
    %c0_i32 = arith.constant 0 : i32
    %c0_i32_0 = arith.constant 0 : i32
    %c0_i32_1 = arith.constant 0 : i32
    return %arg0, %c0_i32, %c0_i32_0 : i32, i32, i32
  }
}

module attributes {stable_mosaic.version = 11 : i64} {
  func.func @_cross_attn_block_kernel(%arg0: i32, %arg1: memref<1x8x32xf32, #tpu.memory_space<vmem>>, %arg2: memref<1x8x32xbf16, #tpu.memory_space<vmem>>, %arg3: memref<1x8x32xbf16, #tpu.memory_space<vmem>>, %arg4: memref<32x32xbf16, #tpu.memory_space<vmem>>, %arg5: memref<1x32xf32, #tpu.memory_space<vmem>>, %arg6: memref<32x32xbf16, #tpu.memory_space<vmem>>, %arg7: memref<1x32xf32, #tpu.memory_space<vmem>>, %arg8: memref<8x8xf32, #tpu.memory_space<vmem>>, %arg9: memref<1x32xf32, #tpu.memory_space<vmem>>, %arg10: memref<1x32xf32, #tpu.memory_space<vmem>>, %arg11: memref<1x8x32xf32, #tpu.memory_space<vmem>>) attributes {dimension_semantics = [#tpu.dimension_semantics<parallel>], iteration_bounds = array<i64: 2>, scalar_prefetch = 0 : i64, scratch_operands = 0 : i64, tpu.core_type = #tpu.core_type<tc>, window_params = [{transform_indices = @transform_0, window_bounds = array<i64: 1, 8, 32>}, {transform_indices = @transform_1, window_bounds = array<i64: 1, 8, 32>}, {transform_indices = @transform_2, window_bounds = array<i64: 1, 8, 32>}, {pipeline_mode = #tpu.pipeline_mode<synchronous>, transform_indices = @transform_3, window_bounds = array<i64: 32, 32>}, {pipeline_mode = #tpu.pipeline_mode<synchronous>, transform_indices = @transform_4, window_bounds = array<i64: 1, 32>}, {pipeline_mode = #tpu.pipeline_mode<synchronous>, transform_indices = @transform_5, window_bounds = array<i64: 32, 32>}, {pipeline_mode = #tpu.pipeline_mode<synchronous>, transform_indices = @transform_6, window_bounds = array<i64: 1, 32>}, {pipeline_mode = #tpu.pipeline_mode<synchronous>, transform_indices = @transform_7, window_bounds = array<i64: 8, 8>}, {pipeline_mode = #tpu.pipeline_mode<synchronous>, transform_indices = @transform_8, window_bounds = array<i64: 1, 32>}, {pipeline_mode = #tpu.pipeline_mode<synchronous>, transform_indices = @transform_9, window_bounds = array<i64: 1, 32>}, {transform_indices = @transform_10, window_bounds = array<i64: 1, 8, 32>}]} {
    %c0 = arith.constant 0 : index
    %c0_0 = arith.constant 0 : index
    %c0_1 = arith.constant 0 : index
    %0 = vector.load %arg1[%c0, %c0_0, %c0_1] : memref<1x8x32xf32, #tpu.memory_space<vmem>>, vector<1x8x32xf32>
    %1 = vector.shape_cast %0 : vector<1x8x32xf32> to vector<8x32xf32>
    %2 = arith.truncf %1 : vector<8x32xf32> to vector<8x32xbf16>
    %c0_2 = arith.constant 0 : index
    %c0_3 = arith.constant 0 : index
    %3 = vector.load %arg4[%c0_2, %c0_3] : memref<32x32xbf16, #tpu.memory_space<vmem>>, vector<32x32xbf16>
    %cst = arith.constant dense<0.000000e+00> : vector<8x32xf32>
    %4 = tpu.matmul %2, %3, %cst {dimension_numbers = #tpu.dot_dimension_numbers<[1], [0], [0], [1], [0, 0, 1, 1], [], []>} : vector<8x32xbf16>, vector<32x32xbf16>, vector<8x32xf32> -> vector<8x32xf32>
    %c0_4 = arith.constant 0 : index
    %c0_5 = arith.constant 0 : index
    %5 = vector.load %arg5[%c0_4, %c0_5] : memref<1x32xf32, #tpu.memory_space<vmem>>, vector<1x32xf32>
    %6 = vector.broadcast %5 : vector<1x32xf32> to vector<8x32xf32>
    %7 = arith.addf %4, %6 : vector<8x32xf32>
    %c0_6 = arith.constant 0 : index
    %c0_7 = arith.constant 0 : index
    %c0_8 = arith.constant 0 : index
    %8 = vector.load %arg2[%c0_6, %c0_7, %c0_8] : memref<1x8x32xbf16, #tpu.memory_space<vmem>>, vector<1x8x32xbf16>
    %9 = vector.shape_cast %8 : vector<1x8x32xbf16> to vector<8x32xbf16>
    %10 = arith.extf %9 : vector<8x32xbf16> to vector<8x32xf32>
    %c0_9 = arith.constant 0 : index
    %c0_10 = arith.constant 0 : index
    %c0_11 = arith.constant 0 : index
    %11 = vector.load %arg3[%c0_9, %c0_10, %c0_11] : memref<1x8x32xbf16, #tpu.memory_space<vmem>>, vector<1x8x32xbf16>
    %12 = vector.shape_cast %11 : vector<1x8x32xbf16> to vector<8x32xbf16>
    %13 = arith.extf %12 : vector<8x32xbf16> to vector<8x32xf32>
    %c0_12 = arith.constant 0 : index
    %c0_13 = arith.constant 0 : index
    %14 = vector.load %arg8[%c0_12, %c0_13] : memref<8x8xf32, #tpu.memory_space<vmem>>, vector<8x8xf32>
    %15 = vector.extract_strided_slice %7 {offsets = [0, 0], sizes = [8, 8], strides = [1, 1]} : vector<8x32xf32> to vector<8x8xf32>
    %16 = arith.truncf %15 : vector<8x8xf32> to vector<8x8xbf16>
    %17 = vector.extract_strided_slice %10 {offsets = [0, 0], sizes = [8, 8], strides = [1, 1]} : vector<8x32xf32> to vector<8x8xf32>
    %18 = arith.truncf %17 : vector<8x8xf32> to vector<8x8xbf16>
    %19 = vector.extract_strided_slice %13 {offsets = [0, 0], sizes = [8, 8], strides = [1, 1]} : vector<8x32xf32> to vector<8x8xf32>
    %20 = arith.truncf %19 : vector<8x8xf32> to vector<8x8xbf16>
    %cst_14 = arith.constant dense<0.000000e+00> : vector<8x8xf32>
    %21 = tpu.matmul %16, %18, %cst_14 {dimension_numbers = #tpu.dot_dimension_numbers<[1], [1], [0], [0], [0, 0, 1, 0], [], []>} : vector<8x8xbf16>, vector<8x8xbf16>, vector<8x8xf32> -> vector<8x8xf32>
    %cst_15 = arith.constant 0.353553385 : f32
    %22 = vector.broadcast %cst_15 : f32 to vector<8x8xf32>
    %23 = arith.mulf %21, %22 : vector<8x8xf32>
    %24 = arith.addf %23, %14 : vector<8x8xf32>
    %cst_16 = arith.constant dense<0xFF800000> : vector<8xf32>
    %25 = vector.multi_reduction <maximumf>, %24, %cst_16 [1] : vector<8x8xf32> to vector<8xf32>
    %26 = vector.shape_cast %25 : vector<8xf32> to vector<8x1xf32>
    %27 = vector.broadcast %26 : vector<8x1xf32> to vector<8x8xf32>
    %28 = arith.subf %24, %27 : vector<8x8xf32>
    %29 = math.exp %28 : vector<8x8xf32>
    %cst_17 = arith.constant dense<0.000000e+00> : vector<8xf32>
    %30 = vector.multi_reduction <add>, %29, %cst_17 [1] : vector<8x8xf32> to vector<8xf32>
    %31 = vector.shape_cast %30 : vector<8xf32> to vector<8x1xf32>
    %32 = tpu.reciprocal %31 {approx = true} : vector<8x1xf32> -> vector<8x1xf32>
    %33 = vector.broadcast %32 : vector<8x1xf32> to vector<8x8xf32>
    %34 = arith.mulf %29, %33 : vector<8x8xf32>
    %35 = arith.truncf %34 : vector<8x8xf32> to vector<8x8xbf16>
    %cst_18 = arith.constant dense<0.000000e+00> : vector<8x8xf32>
    %36 = tpu.matmul %35, %20, %cst_18 {dimension_numbers = #tpu.dot_dimension_numbers<[1], [0], [0], [1], [0, 0, 1, 1], [], []>} : vector<8x8xbf16>, vector<8x8xbf16>, vector<8x8xf32> -> vector<8x8xf32>
    %37 = vector.extract_strided_slice %7 {offsets = [0, 8], sizes = [8, 8], strides = [1, 1]} : vector<8x32xf32> to vector<8x8xf32>
    %38 = arith.truncf %37 : vector<8x8xf32> to vector<8x8xbf16>
    %39 = vector.extract_strided_slice %10 {offsets = [0, 8], sizes = [8, 8], strides = [1, 1]} : vector<8x32xf32> to vector<8x8xf32>
    %40 = arith.truncf %39 : vector<8x8xf32> to vector<8x8xbf16>
    %41 = vector.extract_strided_slice %13 {offsets = [0, 8], sizes = [8, 8], strides = [1, 1]} : vector<8x32xf32> to vector<8x8xf32>
    %42 = arith.truncf %41 : vector<8x8xf32> to vector<8x8xbf16>
    %cst_19 = arith.constant dense<0.000000e+00> : vector<8x8xf32>
    %43 = tpu.matmul %38, %40, %cst_19 {dimension_numbers = #tpu.dot_dimension_numbers<[1], [1], [0], [0], [0, 0, 1, 0], [], []>} : vector<8x8xbf16>, vector<8x8xbf16>, vector<8x8xf32> -> vector<8x8xf32>
    %cst_20 = arith.constant 0.353553385 : f32
    %44 = vector.broadcast %cst_20 : f32 to vector<8x8xf32>
    %45 = arith.mulf %43, %44 : vector<8x8xf32>
    %46 = arith.addf %45, %14 : vector<8x8xf32>
    %cst_21 = arith.constant dense<0xFF800000> : vector<8xf32>
    %47 = vector.multi_reduction <maximumf>, %46, %cst_21 [1] : vector<8x8xf32> to vector<8xf32>
    %48 = vector.shape_cast %47 : vector<8xf32> to vector<8x1xf32>
    %49 = vector.broadcast %48 : vector<8x1xf32> to vector<8x8xf32>
    %50 = arith.subf %46, %49 : vector<8x8xf32>
    %51 = math.exp %50 : vector<8x8xf32>
    %cst_22 = arith.constant dense<0.000000e+00> : vector<8xf32>
    %52 = vector.multi_reduction <add>, %51, %cst_22 [1] : vector<8x8xf32> to vector<8xf32>
    %53 = vector.shape_cast %52 : vector<8xf32> to vector<8x1xf32>
    %54 = tpu.reciprocal %53 {approx = true} : vector<8x1xf32> -> vector<8x1xf32>
    %55 = vector.broadcast %54 : vector<8x1xf32> to vector<8x8xf32>
    %56 = arith.mulf %51, %55 : vector<8x8xf32>
    %57 = arith.truncf %56 : vector<8x8xf32> to vector<8x8xbf16>
    %cst_23 = arith.constant dense<0.000000e+00> : vector<8x8xf32>
    %58 = tpu.matmul %57, %42, %cst_23 {dimension_numbers = #tpu.dot_dimension_numbers<[1], [0], [0], [1], [0, 0, 1, 1], [], []>} : vector<8x8xbf16>, vector<8x8xbf16>, vector<8x8xf32> -> vector<8x8xf32>
    %59 = vector.extract_strided_slice %7 {offsets = [0, 16], sizes = [8, 8], strides = [1, 1]} : vector<8x32xf32> to vector<8x8xf32>
    %60 = arith.truncf %59 : vector<8x8xf32> to vector<8x8xbf16>
    %61 = vector.extract_strided_slice %10 {offsets = [0, 16], sizes = [8, 8], strides = [1, 1]} : vector<8x32xf32> to vector<8x8xf32>
    %62 = arith.truncf %61 : vector<8x8xf32> to vector<8x8xbf16>
    %63 = vector.extract_strided_slice %13 {offsets = [0, 16], sizes = [8, 8], strides = [1, 1]} : vector<8x32xf32> to vector<8x8xf32>
    %64 = arith.truncf %63 : vector<8x8xf32> to vector<8x8xbf16>
    %cst_24 = arith.constant dense<0.000000e+00> : vector<8x8xf32>
    %65 = tpu.matmul %60, %62, %cst_24 {dimension_numbers = #tpu.dot_dimension_numbers<[1], [1], [0], [0], [0, 0, 1, 0], [], []>} : vector<8x8xbf16>, vector<8x8xbf16>, vector<8x8xf32> -> vector<8x8xf32>
    %cst_25 = arith.constant 0.353553385 : f32
    %66 = vector.broadcast %cst_25 : f32 to vector<8x8xf32>
    %67 = arith.mulf %65, %66 : vector<8x8xf32>
    %68 = arith.addf %67, %14 : vector<8x8xf32>
    %cst_26 = arith.constant dense<0xFF800000> : vector<8xf32>
    %69 = vector.multi_reduction <maximumf>, %68, %cst_26 [1] : vector<8x8xf32> to vector<8xf32>
    %70 = vector.shape_cast %69 : vector<8xf32> to vector<8x1xf32>
    %71 = vector.broadcast %70 : vector<8x1xf32> to vector<8x8xf32>
    %72 = arith.subf %68, %71 : vector<8x8xf32>
    %73 = math.exp %72 : vector<8x8xf32>
    %cst_27 = arith.constant dense<0.000000e+00> : vector<8xf32>
    %74 = vector.multi_reduction <add>, %73, %cst_27 [1] : vector<8x8xf32> to vector<8xf32>
    %75 = vector.shape_cast %74 : vector<8xf32> to vector<8x1xf32>
    %76 = tpu.reciprocal %75 {approx = true} : vector<8x1xf32> -> vector<8x1xf32>
    %77 = vector.broadcast %76 : vector<8x1xf32> to vector<8x8xf32>
    %78 = arith.mulf %73, %77 : vector<8x8xf32>
    %79 = arith.truncf %78 : vector<8x8xf32> to vector<8x8xbf16>
    %cst_28 = arith.constant dense<0.000000e+00> : vector<8x8xf32>
    %80 = tpu.matmul %79, %64, %cst_28 {dimension_numbers = #tpu.dot_dimension_numbers<[1], [0], [0], [1], [0, 0, 1, 1], [], []>} : vector<8x8xbf16>, vector<8x8xbf16>, vector<8x8xf32> -> vector<8x8xf32>
    %81 = vector.extract_strided_slice %7 {offsets = [0, 24], sizes = [8, 8], strides = [1, 1]} : vector<8x32xf32> to vector<8x8xf32>
    %82 = arith.truncf %81 : vector<8x8xf32> to vector<8x8xbf16>
    %83 = vector.extract_strided_slice %10 {offsets = [0, 24], sizes = [8, 8], strides = [1, 1]} : vector<8x32xf32> to vector<8x8xf32>
    %84 = arith.truncf %83 : vector<8x8xf32> to vector<8x8xbf16>
    %85 = vector.extract_strided_slice %13 {offsets = [0, 24], sizes = [8, 8], strides = [1, 1]} : vector<8x32xf32> to vector<8x8xf32>
    %86 = arith.truncf %85 : vector<8x8xf32> to vector<8x8xbf16>
    %cst_29 = arith.constant dense<0.000000e+00> : vector<8x8xf32>
    %87 = tpu.matmul %82, %84, %cst_29 {dimension_numbers = #tpu.dot_dimension_numbers<[1], [1], [0], [0], [0, 0, 1, 0], [], []>} : vector<8x8xbf16>, vector<8x8xbf16>, vector<8x8xf32> -> vector<8x8xf32>
    %cst_30 = arith.constant 0.353553385 : f32
    %88 = vector.broadcast %cst_30 : f32 to vector<8x8xf32>
    %89 = arith.mulf %87, %88 : vector<8x8xf32>
    %90 = arith.addf %89, %14 : vector<8x8xf32>
    %cst_31 = arith.constant dense<0xFF800000> : vector<8xf32>
    %91 = vector.multi_reduction <maximumf>, %90, %cst_31 [1] : vector<8x8xf32> to vector<8xf32>
    %92 = vector.shape_cast %91 : vector<8xf32> to vector<8x1xf32>
    %93 = vector.broadcast %92 : vector<8x1xf32> to vector<8x8xf32>
    %94 = arith.subf %90, %93 : vector<8x8xf32>
    %95 = math.exp %94 : vector<8x8xf32>
    %cst_32 = arith.constant dense<0.000000e+00> : vector<8xf32>
    %96 = vector.multi_reduction <add>, %95, %cst_32 [1] : vector<8x8xf32> to vector<8xf32>
    %97 = vector.shape_cast %96 : vector<8xf32> to vector<8x1xf32>
    %98 = tpu.reciprocal %97 {approx = true} : vector<8x1xf32> -> vector<8x1xf32>
    %99 = vector.broadcast %98 : vector<8x1xf32> to vector<8x8xf32>
    %100 = arith.mulf %95, %99 : vector<8x8xf32>
    %101 = arith.truncf %100 : vector<8x8xf32> to vector<8x8xbf16>
    %cst_33 = arith.constant dense<0.000000e+00> : vector<8x8xf32>
    %102 = tpu.matmul %101, %86, %cst_33 {dimension_numbers = #tpu.dot_dimension_numbers<[1], [0], [0], [1], [0, 0, 1, 1], [], []>} : vector<8x8xbf16>, vector<8x8xbf16>, vector<8x8xf32> -> vector<8x8xf32>
    %103 = tpu.concatenate %36, %58, %80, %102 in 1 : vector<8x8xf32>, vector<8x8xf32>, vector<8x8xf32>, vector<8x8xf32> -> vector<8x32xf32>
    %104 = arith.truncf %103 : vector<8x32xf32> to vector<8x32xbf16>
    %c0_34 = arith.constant 0 : index
    %c0_35 = arith.constant 0 : index
    %105 = vector.load %arg6[%c0_34, %c0_35] : memref<32x32xbf16, #tpu.memory_space<vmem>>, vector<32x32xbf16>
    %cst_36 = arith.constant dense<0.000000e+00> : vector<8x32xf32>
    %106 = tpu.matmul %104, %105, %cst_36 {dimension_numbers = #tpu.dot_dimension_numbers<[1], [0], [0], [1], [0, 0, 1, 1], [], []>} : vector<8x32xbf16>, vector<32x32xbf16>, vector<8x32xf32> -> vector<8x32xf32>
    %c0_37 = arith.constant 0 : index
    %c0_38 = arith.constant 0 : index
    %107 = vector.load %arg7[%c0_37, %c0_38] : memref<1x32xf32, #tpu.memory_space<vmem>>, vector<1x32xf32>
    %108 = vector.broadcast %107 : vector<1x32xf32> to vector<8x32xf32>
    %109 = arith.addf %106, %108 : vector<8x32xf32>
    %c0_39 = arith.constant 0 : index
    %c0_40 = arith.constant 0 : index
    %110 = vector.load %arg9[%c0_39, %c0_40] : memref<1x32xf32, #tpu.memory_space<vmem>>, vector<1x32xf32>
    %c0_41 = arith.constant 0 : index
    %c0_42 = arith.constant 0 : index
    %111 = vector.load %arg10[%c0_41, %c0_42] : memref<1x32xf32, #tpu.memory_space<vmem>>, vector<1x32xf32>
    %112 = arith.addf %1, %109 : vector<8x32xf32>
    %cst_43 = arith.constant dense<0.000000e+00> : vector<8xf32>
    %113 = vector.multi_reduction <add>, %112, %cst_43 [1] : vector<8x32xf32> to vector<8xf32>
    %114 = vector.shape_cast %113 : vector<8xf32> to vector<8x1xf32>
    %cst_44 = arith.constant 3.200000e+01 : f32
    %115 = vector.broadcast %cst_44 : f32 to vector<8x1xf32>
    %116 = arith.divf %114, %115 : vector<8x1xf32>
    %117 = vector.broadcast %116 : vector<8x1xf32> to vector<8x32xf32>
    %118 = arith.subf %112, %117 : vector<8x32xf32>
    %119 = arith.mulf %118, %118 : vector<8x32xf32>
    %cst_45 = arith.constant dense<0.000000e+00> : vector<8xf32>
    %120 = vector.multi_reduction <add>, %119, %cst_45 [1] : vector<8x32xf32> to vector<8xf32>
    %121 = vector.shape_cast %120 : vector<8xf32> to vector<8x1xf32>
    %cst_46 = arith.constant 3.200000e+01 : f32
    %122 = vector.broadcast %cst_46 : f32 to vector<8x1xf32>
    %123 = arith.divf %121, %122 : vector<8x1xf32>
    %cst_47 = arith.constant 9.99999974E-6 : f32
    %124 = vector.broadcast %cst_47 : f32 to vector<8x1xf32>
    %125 = arith.addf %123, %124 : vector<8x1xf32>
    %126 = math.rsqrt %125 : vector<8x1xf32>
    %127 = vector.broadcast %126 : vector<8x1xf32> to vector<8x32xf32>
    %128 = arith.mulf %118, %127 : vector<8x32xf32>
    %129 = vector.broadcast %110 : vector<1x32xf32> to vector<8x32xf32>
    %130 = arith.mulf %128, %129 : vector<8x32xf32>
    %131 = vector.broadcast %111 : vector<1x32xf32> to vector<8x32xf32>
    %132 = arith.addf %130, %131 : vector<8x32xf32>
    %c0_48 = arith.constant 0 : index
    %c0_49 = arith.constant 0 : index
    %c0_50 = arith.constant 0 : index
    %133 = vector.load %arg11[%c0_48, %c0_49, %c0_50] : memref<1x8x32xf32, #tpu.memory_space<vmem>>, vector<1x8x32xf32>
    %134 = vector.shape_cast %133 : vector<1x8x32xf32> to vector<8x32xf32>
    %135 = vector.shape_cast %132 : vector<8x32xf32> to vector<1x8x32xf32>
    tpu.vector_store %arg11[%c0_48, %c0_49, %c0_50], %135 {strides = array<i32>} : memref<1x8x32xf32, #tpu.memory_space<vmem>>, vector<1x8x32xf32>,
    return
  }
  func.func @transform_0(%arg0: i32) -> (i32, i32, i32) {
    %c0_i32 = arith.constant 0 : i32
    %c0_i32_0 = arith.constant 0 : i32
    %c0_i32_1 = arith.constant 0 : i32
    return %arg0, %c0_i32, %c0_i32_0 : i32, i32, i32
  }
  func.func @transform_1(%arg0: i32) -> (i32, i32, i32) {
    %c0_i32 = arith.constant 0 : i32
    %c0_i32_0 = arith.constant 0 : i32
    %c0_i32_1 = arith.constant 0 : i32
    return %arg0, %c0_i32, %c0_i32_0 : i32, i32, i32
  }
  func.func @transform_2(%arg0: i32) -> (i32, i32, i32) {
    %c0_i32 = arith.constant 0 : i32
    %c0_i32_0 = arith.constant 0 : i32
    %c0_i32_1 = arith.constant 0 : i32
    return %arg0, %c0_i32, %c0_i32_0 : i32, i32, i32
  }
  func.func @transform_3(%arg0: i32) -> (i32, i32) {
    %c0_i32 = arith.constant 0 : i32
    %c0_i32_0 = arith.constant 0 : i32
    %c0_i32_1 = arith.constant 0 : i32
    return %c0_i32, %c0_i32_0 : i32, i32
  }
  func.func @transform_4(%arg0: i32) -> (i32, i32) {
    %c0_i32 = arith.constant 0 : i32
    %c0_i32_0 = arith.constant 0 : i32
    %c0_i32_1 = arith.constant 0 : i32
    return %c0_i32, %c0_i32_0 : i32, i32
  }
  func.func @transform_5(%arg0: i32) -> (i32, i32) {
    %c0_i32 = arith.constant 0 : i32
    %c0_i32_0 = arith.constant 0 : i32
    %c0_i32_1 = arith.constant 0 : i32
    return %c0_i32, %c0_i32_0 : i32, i32
  }
  func.func @transform_6(%arg0: i32) -> (i32, i32) {
    %c0_i32 = arith.constant 0 : i32
    %c0_i32_0 = arith.constant 0 : i32
    %c0_i32_1 = arith.constant 0 : i32
    return %c0_i32, %c0_i32_0 : i32, i32
  }
  func.func @transform_7(%arg0: i32) -> (i32, i32) {
    %c0_i32 = arith.constant 0 : i32
    %c0_i32_0 = arith.constant 0 : i32
    %c0_i32_1 = arith.constant 0 : i32
    return %c0_i32, %c0_i32_0 : i32, i32
  }
  func.func @transform_8(%arg0: i32) -> (i32, i32) {
    %c0_i32 = arith.constant 0 : i32
    %c0_i32_0 = arith.constant 0 : i32
    %c0_i32_1 = arith.constant 0 : i32
    return %c0_i32, %c0_i32_0 : i32, i32
  }
  func.func @transform_9(%arg0: i32) -> (i32, i32) {
    %c0_i32 = arith.constant 0 : i32
    %c0_i32_0 = arith.constant 0 : i32
    %c0_i32_1 = arith.constant 0 : i32
    return %c0_i32, %c0_i32_0 : i32, i32
  }
  func.func @transform_10(%arg0: i32) -> (i32, i32, i32) {
    %c0_i32 = arith.constant 0 : i32
    %c0_i32_0 = arith.constant 0 : i32
    %c0_i32_1 = arith.constant 0 : i32
    return %arg0, %c0_i32, %c0_i32_0 : i32, i32, i32
  }
}

module attributes {stable_mosaic.version = 11 : i64} {
  func.func @_self_attn_block_kernel(%arg0: i32, %arg1: memref<1x8x32xf32, #tpu.memory_space<vmem>>, %arg2: memref<32x96xbf16, #tpu.memory_space<vmem>>, %arg3: memref<1x96xf32, #tpu.memory_space<vmem>>, %arg4: memref<32x32xbf16, #tpu.memory_space<vmem>>, %arg5: memref<1x32xf32, #tpu.memory_space<vmem>>, %arg6: memref<8x8xf32, #tpu.memory_space<vmem>>, %arg7: memref<1x32xf32, #tpu.memory_space<vmem>>, %arg8: memref<1x32xf32, #tpu.memory_space<vmem>>, %arg9: memref<1x8x32xf32, #tpu.memory_space<vmem>>) attributes {dimension_semantics = [#tpu.dimension_semantics<parallel>], iteration_bounds = array<i64: 2>, scalar_prefetch = 0 : i64, scratch_operands = 0 : i64, tpu.core_type = #tpu.core_type<tc>, window_params = [{transform_indices = @transform_0, window_bounds = array<i64: 1, 8, 32>}, {pipeline_mode = #tpu.pipeline_mode<synchronous>, transform_indices = @transform_1, window_bounds = array<i64: 32, 96>}, {pipeline_mode = #tpu.pipeline_mode<synchronous>, transform_indices = @transform_2, window_bounds = array<i64: 1, 96>}, {pipeline_mode = #tpu.pipeline_mode<synchronous>, transform_indices = @transform_3, window_bounds = array<i64: 32, 32>}, {pipeline_mode = #tpu.pipeline_mode<synchronous>, transform_indices = @transform_4, window_bounds = array<i64: 1, 32>}, {pipeline_mode = #tpu.pipeline_mode<synchronous>, transform_indices = @transform_5, window_bounds = array<i64: 8, 8>}, {pipeline_mode = #tpu.pipeline_mode<synchronous>, transform_indices = @transform_6, window_bounds = array<i64: 1, 32>}, {pipeline_mode = #tpu.pipeline_mode<synchronous>, transform_indices = @transform_7, window_bounds = array<i64: 1, 32>}, {transform_indices = @transform_8, window_bounds = array<i64: 1, 8, 32>}]} {
    %c0 = arith.constant 0 : index
    %c0_0 = arith.constant 0 : index
    %c0_1 = arith.constant 0 : index
    %0 = vector.load %arg1[%c0, %c0_0, %c0_1] : memref<1x8x32xf32, #tpu.memory_space<vmem>>, vector<1x8x32xf32>
    %1 = vector.shape_cast %0 : vector<1x8x32xf32> to vector<8x32xf32>
    %2 = arith.truncf %1 : vector<8x32xf32> to vector<8x32xbf16>
    %c0_2 = arith.constant 0 : index
    %c0_3 = arith.constant 0 : index
    %3 = vector.load %arg2[%c0_2, %c0_3] : memref<32x96xbf16, #tpu.memory_space<vmem>>, vector<32x96xbf16>
    %cst = arith.constant dense<0.000000e+00> : vector<8x96xf32>
    %4 = tpu.matmul %2, %3, %cst {dimension_numbers = #tpu.dot_dimension_numbers<[1], [0], [0], [1], [0, 0, 1, 1], [], []>} : vector<8x32xbf16>, vector<32x96xbf16>, vector<8x96xf32> -> vector<8x96xf32>
    %c0_4 = arith.constant 0 : index
    %c0_5 = arith.constant 0 : index
    %5 = vector.load %arg3[%c0_4, %c0_5] : memref<1x96xf32, #tpu.memory_space<vmem>>, vector<1x96xf32>
    %6 = vector.broadcast %5 : vector<1x96xf32> to vector<8x96xf32>
    %7 = arith.addf %4, %6 : vector<8x96xf32>
    %8 = vector.extract_strided_slice %7 {offsets = [0, 0], sizes = [8, 32], strides = [1, 1]} : vector<8x96xf32> to vector<8x32xf32>
    %9 = vector.extract_strided_slice %7 {offsets = [0, 32], sizes = [8, 32], strides = [1, 1]} : vector<8x96xf32> to vector<8x32xf32>
    %10 = vector.extract_strided_slice %7 {offsets = [0, 64], sizes = [8, 32], strides = [1, 1]} : vector<8x96xf32> to vector<8x32xf32>
    %c0_6 = arith.constant 0 : index
    %c0_7 = arith.constant 0 : index
    %11 = vector.load %arg6[%c0_6, %c0_7] : memref<8x8xf32, #tpu.memory_space<vmem>>, vector<8x8xf32>
    %12 = vector.extract_strided_slice %8 {offsets = [0, 0], sizes = [8, 8], strides = [1, 1]} : vector<8x32xf32> to vector<8x8xf32>
    %13 = arith.truncf %12 : vector<8x8xf32> to vector<8x8xbf16>
    %14 = vector.extract_strided_slice %9 {offsets = [0, 0], sizes = [8, 8], strides = [1, 1]} : vector<8x32xf32> to vector<8x8xf32>
    %15 = arith.truncf %14 : vector<8x8xf32> to vector<8x8xbf16>
    %16 = vector.extract_strided_slice %10 {offsets = [0, 0], sizes = [8, 8], strides = [1, 1]} : vector<8x32xf32> to vector<8x8xf32>
    %17 = arith.truncf %16 : vector<8x8xf32> to vector<8x8xbf16>
    %cst_8 = arith.constant dense<0.000000e+00> : vector<8x8xf32>
    %18 = tpu.matmul %13, %15, %cst_8 {dimension_numbers = #tpu.dot_dimension_numbers<[1], [1], [0], [0], [0, 0, 1, 0], [], []>} : vector<8x8xbf16>, vector<8x8xbf16>, vector<8x8xf32> -> vector<8x8xf32>
    %cst_9 = arith.constant 0.353553385 : f32
    %19 = vector.broadcast %cst_9 : f32 to vector<8x8xf32>
    %20 = arith.mulf %18, %19 : vector<8x8xf32>
    %21 = arith.addf %20, %11 : vector<8x8xf32>
    %cst_10 = arith.constant dense<0xFF800000> : vector<8xf32>
    %22 = vector.multi_reduction <maximumf>, %21, %cst_10 [1] : vector<8x8xf32> to vector<8xf32>
    %23 = vector.shape_cast %22 : vector<8xf32> to vector<8x1xf32>
    %24 = vector.broadcast %23 : vector<8x1xf32> to vector<8x8xf32>
    %25 = arith.subf %21, %24 : vector<8x8xf32>
    %26 = math.exp %25 : vector<8x8xf32>
    %cst_11 = arith.constant dense<0.000000e+00> : vector<8xf32>
    %27 = vector.multi_reduction <add>, %26, %cst_11 [1] : vector<8x8xf32> to vector<8xf32>
    %28 = vector.shape_cast %27 : vector<8xf32> to vector<8x1xf32>
    %29 = tpu.reciprocal %28 {approx = true} : vector<8x1xf32> -> vector<8x1xf32>
    %30 = vector.broadcast %29 : vector<8x1xf32> to vector<8x8xf32>
    %31 = arith.mulf %26, %30 : vector<8x8xf32>
    %32 = arith.truncf %31 : vector<8x8xf32> to vector<8x8xbf16>
    %cst_12 = arith.constant dense<0.000000e+00> : vector<8x8xf32>
    %33 = tpu.matmul %32, %17, %cst_12 {dimension_numbers = #tpu.dot_dimension_numbers<[1], [0], [0], [1], [0, 0, 1, 1], [], []>} : vector<8x8xbf16>, vector<8x8xbf16>, vector<8x8xf32> -> vector<8x8xf32>
    %34 = vector.extract_strided_slice %8 {offsets = [0, 8], sizes = [8, 8], strides = [1, 1]} : vector<8x32xf32> to vector<8x8xf32>
    %35 = arith.truncf %34 : vector<8x8xf32> to vector<8x8xbf16>
    %36 = vector.extract_strided_slice %9 {offsets = [0, 8], sizes = [8, 8], strides = [1, 1]} : vector<8x32xf32> to vector<8x8xf32>
    %37 = arith.truncf %36 : vector<8x8xf32> to vector<8x8xbf16>
    %38 = vector.extract_strided_slice %10 {offsets = [0, 8], sizes = [8, 8], strides = [1, 1]} : vector<8x32xf32> to vector<8x8xf32>
    %39 = arith.truncf %38 : vector<8x8xf32> to vector<8x8xbf16>
    %cst_13 = arith.constant dense<0.000000e+00> : vector<8x8xf32>
    %40 = tpu.matmul %35, %37, %cst_13 {dimension_numbers = #tpu.dot_dimension_numbers<[1], [1], [0], [0], [0, 0, 1, 0], [], []>} : vector<8x8xbf16>, vector<8x8xbf16>, vector<8x8xf32> -> vector<8x8xf32>
    %cst_14 = arith.constant 0.353553385 : f32
    %41 = vector.broadcast %cst_14 : f32 to vector<8x8xf32>
    %42 = arith.mulf %40, %41 : vector<8x8xf32>
    %43 = arith.addf %42, %11 : vector<8x8xf32>
    %cst_15 = arith.constant dense<0xFF800000> : vector<8xf32>
    %44 = vector.multi_reduction <maximumf>, %43, %cst_15 [1] : vector<8x8xf32> to vector<8xf32>
    %45 = vector.shape_cast %44 : vector<8xf32> to vector<8x1xf32>
    %46 = vector.broadcast %45 : vector<8x1xf32> to vector<8x8xf32>
    %47 = arith.subf %43, %46 : vector<8x8xf32>
    %48 = math.exp %47 : vector<8x8xf32>
    %cst_16 = arith.constant dense<0.000000e+00> : vector<8xf32>
    %49 = vector.multi_reduction <add>, %48, %cst_16 [1] : vector<8x8xf32> to vector<8xf32>
    %50 = vector.shape_cast %49 : vector<8xf32> to vector<8x1xf32>
    %51 = tpu.reciprocal %50 {approx = true} : vector<8x1xf32> -> vector<8x1xf32>
    %52 = vector.broadcast %51 : vector<8x1xf32> to vector<8x8xf32>
    %53 = arith.mulf %48, %52 : vector<8x8xf32>
    %54 = arith.truncf %53 : vector<8x8xf32> to vector<8x8xbf16>
    %cst_17 = arith.constant dense<0.000000e+00> : vector<8x8xf32>
    %55 = tpu.matmul %54, %39, %cst_17 {dimension_numbers = #tpu.dot_dimension_numbers<[1], [0], [0], [1], [0, 0, 1, 1], [], []>} : vector<8x8xbf16>, vector<8x8xbf16>, vector<8x8xf32> -> vector<8x8xf32>
    %56 = vector.extract_strided_slice %8 {offsets = [0, 16], sizes = [8, 8], strides = [1, 1]} : vector<8x32xf32> to vector<8x8xf32>
    %57 = arith.truncf %56 : vector<8x8xf32> to vector<8x8xbf16>
    %58 = vector.extract_strided_slice %9 {offsets = [0, 16], sizes = [8, 8], strides = [1, 1]} : vector<8x32xf32> to vector<8x8xf32>
    %59 = arith.truncf %58 : vector<8x8xf32> to vector<8x8xbf16>
    %60 = vector.extract_strided_slice %10 {offsets = [0, 16], sizes = [8, 8], strides = [1, 1]} : vector<8x32xf32> to vector<8x8xf32>
    %61 = arith.truncf %60 : vector<8x8xf32> to vector<8x8xbf16>
    %cst_18 = arith.constant dense<0.000000e+00> : vector<8x8xf32>
    %62 = tpu.matmul %57, %59, %cst_18 {dimension_numbers = #tpu.dot_dimension_numbers<[1], [1], [0], [0], [0, 0, 1, 0], [], []>} : vector<8x8xbf16>, vector<8x8xbf16>, vector<8x8xf32> -> vector<8x8xf32>
    %cst_19 = arith.constant 0.353553385 : f32
    %63 = vector.broadcast %cst_19 : f32 to vector<8x8xf32>
    %64 = arith.mulf %62, %63 : vector<8x8xf32>
    %65 = arith.addf %64, %11 : vector<8x8xf32>
    %cst_20 = arith.constant dense<0xFF800000> : vector<8xf32>
    %66 = vector.multi_reduction <maximumf>, %65, %cst_20 [1] : vector<8x8xf32> to vector<8xf32>
    %67 = vector.shape_cast %66 : vector<8xf32> to vector<8x1xf32>
    %68 = vector.broadcast %67 : vector<8x1xf32> to vector<8x8xf32>
    %69 = arith.subf %65, %68 : vector<8x8xf32>
    %70 = math.exp %69 : vector<8x8xf32>
    %cst_21 = arith.constant dense<0.000000e+00> : vector<8xf32>
    %71 = vector.multi_reduction <add>, %70, %cst_21 [1] : vector<8x8xf32> to vector<8xf32>
    %72 = vector.shape_cast %71 : vector<8xf32> to vector<8x1xf32>
    %73 = tpu.reciprocal %72 {approx = true} : vector<8x1xf32> -> vector<8x1xf32>
    %74 = vector.broadcast %73 : vector<8x1xf32> to vector<8x8xf32>
    %75 = arith.mulf %70, %74 : vector<8x8xf32>
    %76 = arith.truncf %75 : vector<8x8xf32> to vector<8x8xbf16>
    %cst_22 = arith.constant dense<0.000000e+00> : vector<8x8xf32>
    %77 = tpu.matmul %76, %61, %cst_22 {dimension_numbers = #tpu.dot_dimension_numbers<[1], [0], [0], [1], [0, 0, 1, 1], [], []>} : vector<8x8xbf16>, vector<8x8xbf16>, vector<8x8xf32> -> vector<8x8xf32>
    %78 = vector.extract_strided_slice %8 {offsets = [0, 24], sizes = [8, 8], strides = [1, 1]} : vector<8x32xf32> to vector<8x8xf32>
    %79 = arith.truncf %78 : vector<8x8xf32> to vector<8x8xbf16>
    %80 = vector.extract_strided_slice %9 {offsets = [0, 24], sizes = [8, 8], strides = [1, 1]} : vector<8x32xf32> to vector<8x8xf32>
    %81 = arith.truncf %80 : vector<8x8xf32> to vector<8x8xbf16>
    %82 = vector.extract_strided_slice %10 {offsets = [0, 24], sizes = [8, 8], strides = [1, 1]} : vector<8x32xf32> to vector<8x8xf32>
    %83 = arith.truncf %82 : vector<8x8xf32> to vector<8x8xbf16>
    %cst_23 = arith.constant dense<0.000000e+00> : vector<8x8xf32>
    %84 = tpu.matmul %79, %81, %cst_23 {dimension_numbers = #tpu.dot_dimension_numbers<[1], [1], [0], [0], [0, 0, 1, 0], [], []>} : vector<8x8xbf16>, vector<8x8xbf16>, vector<8x8xf32> -> vector<8x8xf32>
    %cst_24 = arith.constant 0.353553385 : f32
    %85 = vector.broadcast %cst_24 : f32 to vector<8x8xf32>
    %86 = arith.mulf %84, %85 : vector<8x8xf32>
    %87 = arith.addf %86, %11 : vector<8x8xf32>
    %cst_25 = arith.constant dense<0xFF800000> : vector<8xf32>
    %88 = vector.multi_reduction <maximumf>, %87, %cst_25 [1] : vector<8x8xf32> to vector<8xf32>
    %89 = vector.shape_cast %88 : vector<8xf32> to vector<8x1xf32>
    %90 = vector.broadcast %89 : vector<8x1xf32> to vector<8x8xf32>
    %91 = arith.subf %87, %90 : vector<8x8xf32>
    %92 = math.exp %91 : vector<8x8xf32>
    %cst_26 = arith.constant dense<0.000000e+00> : vector<8xf32>
    %93 = vector.multi_reduction <add>, %92, %cst_26 [1] : vector<8x8xf32> to vector<8xf32>
    %94 = vector.shape_cast %93 : vector<8xf32> to vector<8x1xf32>
    %95 = tpu.reciprocal %94 {approx = true} : vector<8x1xf32> -> vector<8x1xf32>
    %96 = vector.broadcast %95 : vector<8x1xf32> to vector<8x8xf32>
    %97 = arith.mulf %92, %96 : vector<8x8xf32>
    %98 = arith.truncf %97 : vector<8x8xf32> to vector<8x8xbf16>
    %cst_27 = arith.constant dense<0.000000e+00> : vector<8x8xf32>
    %99 = tpu.matmul %98, %83, %cst_27 {dimension_numbers = #tpu.dot_dimension_numbers<[1], [0], [0], [1], [0, 0, 1, 1], [], []>} : vector<8x8xbf16>, vector<8x8xbf16>, vector<8x8xf32> -> vector<8x8xf32>
    %100 = tpu.concatenate %33, %55, %77, %99 in 1 : vector<8x8xf32>, vector<8x8xf32>, vector<8x8xf32>, vector<8x8xf32> -> vector<8x32xf32>
    %101 = arith.truncf %100 : vector<8x32xf32> to vector<8x32xbf16>
    %c0_28 = arith.constant 0 : index
    %c0_29 = arith.constant 0 : index
    %102 = vector.load %arg4[%c0_28, %c0_29] : memref<32x32xbf16, #tpu.memory_space<vmem>>, vector<32x32xbf16>
    %cst_30 = arith.constant dense<0.000000e+00> : vector<8x32xf32>
    %103 = tpu.matmul %101, %102, %cst_30 {dimension_numbers = #tpu.dot_dimension_numbers<[1], [0], [0], [1], [0, 0, 1, 1], [], []>} : vector<8x32xbf16>, vector<32x32xbf16>, vector<8x32xf32> -> vector<8x32xf32>
    %c0_31 = arith.constant 0 : index
    %c0_32 = arith.constant 0 : index
    %104 = vector.load %arg5[%c0_31, %c0_32] : memref<1x32xf32, #tpu.memory_space<vmem>>, vector<1x32xf32>
    %105 = vector.broadcast %104 : vector<1x32xf32> to vector<8x32xf32>
    %106 = arith.addf %103, %105 : vector<8x32xf32>
    %c0_33 = arith.constant 0 : index
    %c0_34 = arith.constant 0 : index
    %107 = vector.load %arg7[%c0_33, %c0_34] : memref<1x32xf32, #tpu.memory_space<vmem>>, vector<1x32xf32>
    %c0_35 = arith.constant 0 : index
    %c0_36 = arith.constant 0 : index
    %108 = vector.load %arg8[%c0_35, %c0_36] : memref<1x32xf32, #tpu.memory_space<vmem>>, vector<1x32xf32>
    %109 = arith.addf %1, %106 : vector<8x32xf32>
    %cst_37 = arith.constant dense<0.000000e+00> : vector<8xf32>
    %110 = vector.multi_reduction <add>, %109, %cst_37 [1] : vector<8x32xf32> to vector<8xf32>
    %111 = vector.shape_cast %110 : vector<8xf32> to vector<8x1xf32>
    %cst_38 = arith.constant 3.200000e+01 : f32
    %112 = vector.broadcast %cst_38 : f32 to vector<8x1xf32>
    %113 = arith.divf %111, %112 : vector<8x1xf32>
    %114 = vector.broadcast %113 : vector<8x1xf32> to vector<8x32xf32>
    %115 = arith.subf %109, %114 : vector<8x32xf32>
    %116 = arith.mulf %115, %115 : vector<8x32xf32>
    %cst_39 = arith.constant dense<0.000000e+00> : vector<8xf32>
    %117 = vector.multi_reduction <add>, %116, %cst_39 [1] : vector<8x32xf32> to vector<8xf32>
    %118 = vector.shape_cast %117 : vector<8xf32> to vector<8x1xf32>
    %cst_40 = arith.constant 3.200000e+01 : f32
    %119 = vector.broadcast %cst_40 : f32 to vector<8x1xf32>
    %120 = arith.divf %118, %119 : vector<8x1xf32>
    %cst_41 = arith.constant 9.99999974E-6 : f32
    %121 = vector.broadcast %cst_41 : f32 to vector<8x1xf32>
    %122 = arith.addf %120, %121 : vector<8x1xf32>
    %123 = math.rsqrt %122 : vector<8x1xf32>
    %124 = vector.broadcast %123 : vector<8x1xf32> to vector<8x32xf32>
    %125 = arith.mulf %115, %124 : vector<8x32xf32>
    %126 = vector.broadcast %107 : vector<1x32xf32> to vector<8x32xf32>
    %127 = arith.mulf %125, %126 : vector<8x32xf32>
    %128 = vector.broadcast %108 : vector<1x32xf32> to vector<8x32xf32>
    %129 = arith.addf %127, %128 : vector<8x32xf32>
    %c0_42 = arith.constant 0 : index
    %c0_43 = arith.constant 0 : index
    %c0_44 = arith.constant 0 : index
    %130 = vector.load %arg9[%c0_42, %c0_43, %c0_44] : memref<1x8x32xf32, #tpu.memory_space<vmem>>, vector<1x8x32xf32>
    %131 = vector.shape_cast %130 : vector<1x8x32xf32> to vector<8x32xf32>
    %132 = vector.shape_cast %129 : vector<8x32xf32> to vector<1x8x32xf32>
    tpu.vector_store %arg9[%c0_42, %c0_43, %c0_44], %132 {strides = array<i32>} : memref<1x8x32xf32, #tpu.memory_space<vmem>>, vector<1x8x32xf32>,
    return
  }
  func.func @transform_0(%arg0: i32) -> (i32, i32, i32) {
    %c0_i32 = arith.constant 0 : i32
    %c0_i32_0 = arith.constant 0 : i32
    %c0_i32_1 = arith.constant 0 : i32
    return %arg0, %c0_i32, %c0_i32_0 : i32, i32, i32
  }
  func.func @transform_1(%arg0: i32) -> (i32, i32) {
    %c0_i32 = arith.constant 0 : i32
    %c0_i32_0 = arith.constant 0 : i32
    %c0_i32_1 = arith.constant 0 : i32
    return %c0_i32, %c0_i32_0 : i32, i32
  }
  func.func @transform_2(%arg0: i32) -> (i32, i32) {
    %c0_i32 = arith.constant 0 : i32
    %c0_i32_0 = arith.constant 0 : i32
    %c0_i32_1 = arith.constant 0 : i32
    return %c0_i32, %c0_i32_0 : i32, i32
  }
  func.func @transform_3(%arg0: i32) -> (i32, i32) {
    %c0_i32 = arith.constant 0 : i32
    %c0_i32_0 = arith.constant 0 : i32
    %c0_i32_1 = arith.constant 0 : i32
    return %c0_i32, %c0_i32_0 : i32, i32
  }
  func.func @transform_4(%arg0: i32) -> (i32, i32) {
    %c0_i32 = arith.constant 0 : i32
    %c0_i32_0 = arith.constant 0 : i32
    %c0_i32_1 = arith.constant 0 : i32
    return %c0_i32, %c0_i32_0 : i32, i32
  }
  func.func @transform_5(%arg0: i32) -> (i32, i32) {
    %c0_i32 = arith.constant 0 : i32
    %c0_i32_0 = arith.constant 0 : i32
    %c0_i32_1 = arith.constant 0 : i32
    return %c0_i32, %c0_i32_0 : i32, i32
  }
  func.func @transform_6(%arg0: i32) -> (i32, i32) {
    %c0_i32 = arith.constant 0 : i32
    %c0_i32_0 = arith.constant 0 : i32
    %c0_i32_1 = arith.constant 0 : i32
    return %c0_i32, %c0_i32_0 : i32, i32
  }
  func.func @transform_7(%arg0: i32) -> (i32, i32) {
    %c0_i32 = arith.constant 0 : i32
    %c0_i32_0 = arith.constant 0 : i32
    %c0_i32_1 = arith.constant 0 : i32
    return %c0_i32, %c0_i32_0 : i32, i32
  }
  func.func @transform_8(%arg0: i32) -> (i32, i32, i32) {
    %c0_i32 = arith.constant 0 : i32
    %c0_i32_0 = arith.constant 0 : i32
    %c0_i32_1 = arith.constant 0 : i32
    return %arg0, %c0_i32, %c0_i32_0 : i32, i32, i32
  }
}

module attributes {stable_mosaic.version = 11 : i64} {
  func.func @_ffn_block_kernel(%arg0: i32, %arg1: memref<1x8x32xf32, #tpu.memory_space<vmem>>, %arg2: memref<32x64xbf16, #tpu.memory_space<vmem>>, %arg3: memref<1x64xf32, #tpu.memory_space<vmem>>, %arg4: memref<64x32xbf16, #tpu.memory_space<vmem>>, %arg5: memref<1x32xf32, #tpu.memory_space<vmem>>, %arg6: memref<1x32xf32, #tpu.memory_space<vmem>>, %arg7: memref<1x32xf32, #tpu.memory_space<vmem>>, %arg8: memref<1x8x32xf32, #tpu.memory_space<vmem>>) attributes {dimension_semantics = [#tpu.dimension_semantics<parallel>], iteration_bounds = array<i64: 2>, scalar_prefetch = 0 : i64, scratch_operands = 0 : i64, tpu.core_type = #tpu.core_type<tc>, window_params = [{transform_indices = @transform_0, window_bounds = array<i64: 1, 8, 32>}, {pipeline_mode = #tpu.pipeline_mode<synchronous>, transform_indices = @transform_1, window_bounds = array<i64: 32, 64>}, {pipeline_mode = #tpu.pipeline_mode<synchronous>, transform_indices = @transform_2, window_bounds = array<i64: 1, 64>}, {pipeline_mode = #tpu.pipeline_mode<synchronous>, transform_indices = @transform_3, window_bounds = array<i64: 64, 32>}, {pipeline_mode = #tpu.pipeline_mode<synchronous>, transform_indices = @transform_4, window_bounds = array<i64: 1, 32>}, {pipeline_mode = #tpu.pipeline_mode<synchronous>, transform_indices = @transform_5, window_bounds = array<i64: 1, 32>}, {pipeline_mode = #tpu.pipeline_mode<synchronous>, transform_indices = @transform_6, window_bounds = array<i64: 1, 32>}, {transform_indices = @transform_7, window_bounds = array<i64: 1, 8, 32>}]} {
    %c0 = arith.constant 0 : index
    %c0_0 = arith.constant 0 : index
    %c0_1 = arith.constant 0 : index
    %0 = vector.load %arg1[%c0, %c0_0, %c0_1] : memref<1x8x32xf32, #tpu.memory_space<vmem>>, vector<1x8x32xf32>
    %1 = vector.shape_cast %0 : vector<1x8x32xf32> to vector<8x32xf32>
    %2 = arith.truncf %1 : vector<8x32xf32> to vector<8x32xbf16>
    %c0_2 = arith.constant 0 : index
    %c0_3 = arith.constant 0 : index
    %3 = vector.load %arg2[%c0_2, %c0_3] : memref<32x64xbf16, #tpu.memory_space<vmem>>, vector<32x64xbf16>
    %cst = arith.constant dense<0.000000e+00> : vector<8x64xf32>
    %4 = tpu.matmul %2, %3, %cst {dimension_numbers = #tpu.dot_dimension_numbers<[1], [0], [0], [1], [0, 0, 1, 1], [], []>} : vector<8x32xbf16>, vector<32x64xbf16>, vector<8x64xf32> -> vector<8x64xf32>
    %c0_4 = arith.constant 0 : index
    %c0_5 = arith.constant 0 : index
    %5 = vector.load %arg3[%c0_4, %c0_5] : memref<1x64xf32, #tpu.memory_space<vmem>>, vector<1x64xf32>
    %6 = vector.broadcast %5 : vector<1x64xf32> to vector<8x64xf32>
    %7 = arith.addf %4, %6 : vector<8x64xf32>
    %cst_6 = arith.constant 0.000000e+00 : f32
    %8 = vector.broadcast %cst_6 : f32 to vector<8x64xf32>
    %9 = arith.maximumf %7, %8 : vector<8x64xf32>
    %10 = arith.truncf %9 : vector<8x64xf32> to vector<8x64xbf16>
    %c0_7 = arith.constant 0 : index
    %c0_8 = arith.constant 0 : index
    %11 = vector.load %arg4[%c0_7, %c0_8] : memref<64x32xbf16, #tpu.memory_space<vmem>>, vector<64x32xbf16>
    %cst_9 = arith.constant dense<0.000000e+00> : vector<8x32xf32>
    %12 = tpu.matmul %10, %11, %cst_9 {dimension_numbers = #tpu.dot_dimension_numbers<[1], [0], [0], [1], [0, 0, 1, 1], [], []>} : vector<8x64xbf16>, vector<64x32xbf16>, vector<8x32xf32> -> vector<8x32xf32>
    %c0_10 = arith.constant 0 : index
    %c0_11 = arith.constant 0 : index
    %13 = vector.load %arg5[%c0_10, %c0_11] : memref<1x32xf32, #tpu.memory_space<vmem>>, vector<1x32xf32>
    %14 = vector.broadcast %13 : vector<1x32xf32> to vector<8x32xf32>
    %15 = arith.addf %12, %14 : vector<8x32xf32>
    %c0_12 = arith.constant 0 : index
    %c0_13 = arith.constant 0 : index
    %16 = vector.load %arg6[%c0_12, %c0_13] : memref<1x32xf32, #tpu.memory_space<vmem>>, vector<1x32xf32>
    %c0_14 = arith.constant 0 : index
    %c0_15 = arith.constant 0 : index
    %17 = vector.load %arg7[%c0_14, %c0_15] : memref<1x32xf32, #tpu.memory_space<vmem>>, vector<1x32xf32>
    %18 = arith.addf %1, %15 : vector<8x32xf32>
    %cst_16 = arith.constant dense<0.000000e+00> : vector<8xf32>
    %19 = vector.multi_reduction <add>, %18, %cst_16 [1] : vector<8x32xf32> to vector<8xf32>
    %20 = vector.shape_cast %19 : vector<8xf32> to vector<8x1xf32>
    %cst_17 = arith.constant 3.200000e+01 : f32
    %21 = vector.broadcast %cst_17 : f32 to vector<8x1xf32>
    %22 = arith.divf %20, %21 : vector<8x1xf32>
    %23 = vector.broadcast %22 : vector<8x1xf32> to vector<8x32xf32>
    %24 = arith.subf %18, %23 : vector<8x32xf32>
    %25 = arith.mulf %24, %24 : vector<8x32xf32>
    %cst_18 = arith.constant dense<0.000000e+00> : vector<8xf32>
    %26 = vector.multi_reduction <add>, %25, %cst_18 [1] : vector<8x32xf32> to vector<8xf32>
    %27 = vector.shape_cast %26 : vector<8xf32> to vector<8x1xf32>
    %cst_19 = arith.constant 3.200000e+01 : f32
    %28 = vector.broadcast %cst_19 : f32 to vector<8x1xf32>
    %29 = arith.divf %27, %28 : vector<8x1xf32>
    %cst_20 = arith.constant 9.99999974E-6 : f32
    %30 = vector.broadcast %cst_20 : f32 to vector<8x1xf32>
    %31 = arith.addf %29, %30 : vector<8x1xf32>
    %32 = math.rsqrt %31 : vector<8x1xf32>
    %33 = vector.broadcast %32 : vector<8x1xf32> to vector<8x32xf32>
    %34 = arith.mulf %24, %33 : vector<8x32xf32>
    %35 = vector.broadcast %16 : vector<1x32xf32> to vector<8x32xf32>
    %36 = arith.mulf %34, %35 : vector<8x32xf32>
    %37 = vector.broadcast %17 : vector<1x32xf32> to vector<8x32xf32>
    %38 = arith.addf %36, %37 : vector<8x32xf32>
    %c0_21 = arith.constant 0 : index
    %c0_22 = arith.constant 0 : index
    %c0_23 = arith.constant 0 : index
    %39 = vector.load %arg8[%c0_21, %c0_22, %c0_23] : memref<1x8x32xf32, #tpu.memory_space<vmem>>, vector<1x8x32xf32>
    %40 = vector.shape_cast %39 : vector<1x8x32xf32> to vector<8x32xf32>
    %41 = vector.shape_cast %38 : vector<8x32xf32> to vector<1x8x32xf32>
    tpu.vector_store %arg8[%c0_21, %c0_22, %c0_23], %41 {strides = array<i32>} : memref<1x8x32xf32, #tpu.memory_space<vmem>>, vector<1x8x32xf32>,
    return
  }
  func.func @transform_0(%arg0: i32) -> (i32, i32, i32) {
    %c0_i32 = arith.constant 0 : i32
    %c0_i32_0 = arith.constant 0 : i32
    %c0_i32_1 = arith.constant 0 : i32
    return %arg0, %c0_i32, %c0_i32_0 : i32, i32, i32
  }
  func.func @transform_1(%arg0: i32) -> (i32, i32) {
    %c0_i32 = arith.constant 0 : i32
    %c0_i32_0 = arith.constant 0 : i32
    %c0_i32_1 = arith.constant 0 : i32
    return %c0_i32, %c0_i32_0 : i32, i32
  }
  func.func @transform_2(%arg0: i32) -> (i32, i32) {
    %c0_i32 = arith.constant 0 : i32
    %c0_i32_0 = arith.constant 0 : i32
    %c0_i32_1 = arith.constant 0 : i32
    return %c0_i32, %c0_i32_0 : i32, i32
  }
  func.func @transform_3(%arg0: i32) -> (i32, i32) {
    %c0_i32 = arith.constant 0 : i32
    %c0_i32_0 = arith.constant 0 : i32
    %c0_i32_1 = arith.constant 0 : i32
    return %c0_i32, %c0_i32_0 : i32, i32
  }
  func.func @transform_4(%arg0: i32) -> (i32, i32) {
    %c0_i32 = arith.constant 0 : i32
    %c0_i32_0 = arith.constant 0 : i32
    %c0_i32_1 = arith.constant 0 : i32
    return %c0_i32, %c0_i32_0 : i32, i32
  }
  func.func @transform_5(%arg0: i32) -> (i32, i32) {
    %c0_i32 = arith.constant 0 : i32
    %c0_i32_0 = arith.constant 0 : i32
    %c0_i32_1 = arith.constant 0 : i32
    return %c0_i32, %c0_i32_0 : i32, i32
  }
  func.func @transform_6(%arg0: i32) -> (i32, i32) {
    %c0_i32 = arith.constant 0 : i32
    %c0_i32_0 = arith.constant 0 : i32
    %c0_i32_1 = arith.constant 0 : i32
    return %c0_i32, %c0_i32_0 : i32, i32
  }
  func.func @transform_7(%arg0: i32) -> (i32, i32, i32) {
    %c0_i32 = arith.constant 0 : i32
    %c0_i32_0 = arith.constant 0 : i32
    %c0_i32_1 = arith.constant 0 : i32
    return %arg0, %c0_i32, %c0_i32_0 : i32, i32, i32
  }
}

module attributes {stable_mosaic.version = 11 : i64} {
  func.func @_ffn_block_kernel(%arg0: i32, %arg1: memref<1x8x32xf32, #tpu.memory_space<vmem>>, %arg2: memref<32x64xbf16, #tpu.memory_space<vmem>>, %arg3: memref<1x64xf32, #tpu.memory_space<vmem>>, %arg4: memref<64x32xbf16, #tpu.memory_space<vmem>>, %arg5: memref<1x32xf32, #tpu.memory_space<vmem>>, %arg6: memref<1x32xf32, #tpu.memory_space<vmem>>, %arg7: memref<1x32xf32, #tpu.memory_space<vmem>>, %arg8: memref<1x8x32xf32, #tpu.memory_space<vmem>>) attributes {dimension_semantics = [#tpu.dimension_semantics<parallel>], iteration_bounds = array<i64: 2>, scalar_prefetch = 0 : i64, scratch_operands = 0 : i64, tpu.core_type = #tpu.core_type<tc>, window_params = [{transform_indices = @transform_0, window_bounds = array<i64: 1, 8, 32>}, {pipeline_mode = #tpu.pipeline_mode<synchronous>, transform_indices = @transform_1, window_bounds = array<i64: 32, 64>}, {pipeline_mode = #tpu.pipeline_mode<synchronous>, transform_indices = @transform_2, window_bounds = array<i64: 1, 64>}, {pipeline_mode = #tpu.pipeline_mode<synchronous>, transform_indices = @transform_3, window_bounds = array<i64: 64, 32>}, {pipeline_mode = #tpu.pipeline_mode<synchronous>, transform_indices = @transform_4, window_bounds = array<i64: 1, 32>}, {pipeline_mode = #tpu.pipeline_mode<synchronous>, transform_indices = @transform_5, window_bounds = array<i64: 1, 32>}, {pipeline_mode = #tpu.pipeline_mode<synchronous>, transform_indices = @transform_6, window_bounds = array<i64: 1, 32>}, {transform_indices = @transform_7, window_bounds = array<i64: 1, 8, 32>}]} {
    %c0 = arith.constant 0 : index
    %c0_0 = arith.constant 0 : index
    %c0_1 = arith.constant 0 : index
    %0 = vector.load %arg1[%c0, %c0_0, %c0_1] : memref<1x8x32xf32, #tpu.memory_space<vmem>>, vector<1x8x32xf32>
    %1 = vector.shape_cast %0 : vector<1x8x32xf32> to vector<8x32xf32>
    %2 = arith.truncf %1 : vector<8x32xf32> to vector<8x32xbf16>
    %c0_2 = arith.constant 0 : index
    %c0_3 = arith.constant 0 : index
    %3 = vector.load %arg2[%c0_2, %c0_3] : memref<32x64xbf16, #tpu.memory_space<vmem>>, vector<32x64xbf16>
    %cst = arith.constant dense<0.000000e+00> : vector<8x64xf32>
    %4 = tpu.matmul %2, %3, %cst {dimension_numbers = #tpu.dot_dimension_numbers<[1], [0], [0], [1], [0, 0, 1, 1], [], []>} : vector<8x32xbf16>, vector<32x64xbf16>, vector<8x64xf32> -> vector<8x64xf32>
    %c0_4 = arith.constant 0 : index
    %c0_5 = arith.constant 0 : index
    %5 = vector.load %arg3[%c0_4, %c0_5] : memref<1x64xf32, #tpu.memory_space<vmem>>, vector<1x64xf32>
    %6 = vector.broadcast %5 : vector<1x64xf32> to vector<8x64xf32>
    %7 = arith.addf %4, %6 : vector<8x64xf32>
    %cst_6 = arith.constant 0.000000e+00 : f32
    %8 = vector.broadcast %cst_6 : f32 to vector<8x64xf32>
    %9 = arith.maximumf %7, %8 : vector<8x64xf32>
    %10 = arith.truncf %9 : vector<8x64xf32> to vector<8x64xbf16>
    %c0_7 = arith.constant 0 : index
    %c0_8 = arith.constant 0 : index
    %11 = vector.load %arg4[%c0_7, %c0_8] : memref<64x32xbf16, #tpu.memory_space<vmem>>, vector<64x32xbf16>
    %cst_9 = arith.constant dense<0.000000e+00> : vector<8x32xf32>
    %12 = tpu.matmul %10, %11, %cst_9 {dimension_numbers = #tpu.dot_dimension_numbers<[1], [0], [0], [1], [0, 0, 1, 1], [], []>} : vector<8x64xbf16>, vector<64x32xbf16>, vector<8x32xf32> -> vector<8x32xf32>
    %c0_10 = arith.constant 0 : index
    %c0_11 = arith.constant 0 : index
    %13 = vector.load %arg5[%c0_10, %c0_11] : memref<1x32xf32, #tpu.memory_space<vmem>>, vector<1x32xf32>
    %14 = vector.broadcast %13 : vector<1x32xf32> to vector<8x32xf32>
    %15 = arith.addf %12, %14 : vector<8x32xf32>
    %c0_12 = arith.constant 0 : index
    %c0_13 = arith.constant 0 : index
    %16 = vector.load %arg6[%c0_12, %c0_13] : memref<1x32xf32, #tpu.memory_space<vmem>>, vector<1x32xf32>
    %c0_14 = arith.constant 0 : index
    %c0_15 = arith.constant 0 : index
    %17 = vector.load %arg7[%c0_14, %c0_15] : memref<1x32xf32, #tpu.memory_space<vmem>>, vector<1x32xf32>
    %18 = arith.addf %1, %15 : vector<8x32xf32>
    %cst_16 = arith.constant dense<0.000000e+00> : vector<8xf32>
    %19 = vector.multi_reduction <add>, %18, %cst_16 [1] : vector<8x32xf32> to vector<8xf32>
    %20 = vector.shape_cast %19 : vector<8xf32> to vector<8x1xf32>
    %cst_17 = arith.constant 3.200000e+01 : f32
    %21 = vector.broadcast %cst_17 : f32 to vector<8x1xf32>
    %22 = arith.divf %20, %21 : vector<8x1xf32>
    %23 = vector.broadcast %22 : vector<8x1xf32> to vector<8x32xf32>
    %24 = arith.subf %18, %23 : vector<8x32xf32>
    %25 = arith.mulf %24, %24 : vector<8x32xf32>
    %cst_18 = arith.constant dense<0.000000e+00> : vector<8xf32>
    %26 = vector.multi_reduction <add>, %25, %cst_18 [1] : vector<8x32xf32> to vector<8xf32>
    %27 = vector.shape_cast %26 : vector<8xf32> to vector<8x1xf32>
    %cst_19 = arith.constant 3.200000e+01 : f32
    %28 = vector.broadcast %cst_19 : f32 to vector<8x1xf32>
    %29 = arith.divf %27, %28 : vector<8x1xf32>
    %cst_20 = arith.constant 9.99999974E-6 : f32
    %30 = vector.broadcast %cst_20 : f32 to vector<8x1xf32>
    %31 = arith.addf %29, %30 : vector<8x1xf32>
    %32 = math.rsqrt %31 : vector<8x1xf32>
    %33 = vector.broadcast %32 : vector<8x1xf32> to vector<8x32xf32>
    %34 = arith.mulf %24, %33 : vector<8x32xf32>
    %35 = vector.broadcast %16 : vector<1x32xf32> to vector<8x32xf32>
    %36 = arith.mulf %34, %35 : vector<8x32xf32>
    %37 = vector.broadcast %17 : vector<1x32xf32> to vector<8x32xf32>
    %38 = arith.addf %36, %37 : vector<8x32xf32>
    %c0_21 = arith.constant 0 : index
    %c0_22 = arith.constant 0 : index
    %c0_23 = arith.constant 0 : index
    %39 = vector.load %arg8[%c0_21, %c0_22, %c0_23] : memref<1x8x32xf32, #tpu.memory_space<vmem>>, vector<1x8x32xf32>
    %40 = vector.shape_cast %39 : vector<1x8x32xf32> to vector<8x32xf32>
    %41 = vector.shape_cast %38 : vector<8x32xf32> to vector<1x8x32xf32>
    tpu.vector_store %arg8[%c0_21, %c0_22, %c0_23], %41 {strides = array<i32>} : memref<1x8x32xf32, #tpu.memory_space<vmem>>, vector<1x8x32xf32>,
    return
  }
  func.func @transform_0(%arg0: i32) -> (i32, i32, i32) {
    %c0_i32 = arith.constant 0 : i32
    %c0_i32_0 = arith.constant 0 : i32
    %c0_i32_1 = arith.constant 0 : i32
    return %arg0, %c0_i32, %c0_i32_0 : i32, i32, i32
  }
  func.func @transform_1(%arg0: i32) -> (i32, i32) {
    %c0_i32 = arith.constant 0 : i32
    %c0_i32_0 = arith.constant 0 : i32
    %c0_i32_1 = arith.constant 0 : i32
    return %c0_i32, %c0_i32_0 : i32, i32
  }
  func.func @transform_2(%arg0: i32) -> (i32, i32) {
    %c0_i32 = arith.constant 0 : i32
    %c0_i32_0 = arith.constant 0 : i32
    %c0_i32_1 = arith.constant 0 : i32
    return %c0_i32, %c0_i32_0 : i32, i32
  }
  func.func @transform_3(%arg0: i32) -> (i32, i32) {
    %c0_i32 = arith.constant 0 : i32
    %c0_i32_0 = arith.constant 0 : i32
    %c0_i32_1 = arith.constant 0 : i32
    return %c0_i32, %c0_i32_0 : i32, i32
  }
  func.func @transform_4(%arg0: i32) -> (i32, i32) {
    %c0_i32 = arith.constant 0 : i32
    %c0_i32_0 = arith.constant 0 : i32
    %c0_i32_1 = arith.constant 0 : i32
    return %c0_i32, %c0_i32_0 : i32, i32
  }
  func.func @transform_5(%arg0: i32) -> (i32, i32) {
    %c0_i32 = arith.constant 0 : i32
    %c0_i32_0 = arith.constant 0 : i32
    %c0_i32_1 = arith.constant 0 : i32
    return %c0_i32, %c0_i32_0 : i32, i32
  }
  func.func @transform_6(%arg0: i32) -> (i32, i32) {
    %c0_i32 = arith.constant 0 : i32
    %c0_i32_0 = arith.constant 0 : i32
    %c0_i32_1 = arith.constant 0 : i32
    return %c0_i32, %c0_i32_0 : i32, i32
  }
  func.func @transform_7(%arg0: i32) -> (i32, i32, i32) {
    %c0_i32 = arith.constant 0 : i32
    %c0_i32_0 = arith.constant 0 : i32
    %c0_i32_1 = arith.constant 0 : i32
    return %arg0, %c0_i32, %c0_i32_0 : i32, i32, i32
  }
}

</mosaic_0001>

<bundles_post_ra>
// kernel: transformer_decoder.7
= control target key start
LH: loop header
LB: loop body
LE: loop exit
PB: predicated region body
PF: predicated region fallthrough
CT: control target
= control target key end

     0   :  { %s444_s15 = smov 0   ;;  %s473_s0 = inlined_call_operand.vmem [shape: f32[2,8,32], index: 0, kind: input, shape index: {}]   ;;  %s474_s1 = inlined_call_operand.vmem [shape: bf16[32,64], index: 1, kind: input, shape index: {}]   ;;  %s475_s2 = inlined_call_operand.vmem [shape: f32[1,64], index: 2, kind: input, shape index: {}]   ;;  %s476_s3 = inlined_call_operand.vmem [shape: bf16[2,8,32], index: 3, kind: output, shape index: {0}]   ;;  %s477_s4 = inlined_call_operand.vmem [shape: bf16[2,8,32], index: 4, kind: output, shape index: {1}]  }
   0x1 LB: > { %s368_s16 = sadd.s32 4294967295, %s414_s15   ;;  %p372_p0 = scmp.ge.s32.totalorder %s414_s15, 1  ;;  %s414_s15 = sphi %s444_s15, %s15_s15  }
   0x2   : > { %p164_p1 = scmp.lt.s32.totalorder %s414_s15, 3 }
   0x4   : > { %p165_p2 = pnand %p372_p0, %p164_p1 }
   0x5   : > { %v406_v0 = vld [vmem:[%s474_s1] sm:$0xff] (!%p165_p2)   ;;  %v416_v1 = vmov (!%p165_p2), 0.0   ;;  %v407_v2 = vld [vmem:[%s474_s1 + $0x8] sm:$0xff] (!%p165_p2)   ;;  %vm417_vm0 = vmmov (!%p165_p2), 0   ;;  %p192_p3 = scmp.lt.s32.totalorder (!%p165_p2), %s368_s16, 1  ;;  %vm230_vm1 = vcmask (!%p165_p2), 261120  }
   0x6   : > { %168 = sbr.rel (%p165_p2) target bundleno = 351 (0x15f), region = 32  ;;  %387 = vmatprep.subr.bf16.mxu0 (!%p165_p2), %v416_v1  ;;  %391 = vmatprep.mubr.msk.bf16.mxu0 (!%p165_p2), %vm417_vm0, %v416_v1  ;;  %v376_v5 = vld [vmem:[%s475_s2] ss:$0 sm:$0xff] (!%p165_p2)  ;;  %vm275_vm2 = vcmask (!%p165_p2), 257024   ;;  %s418_s5 = smov (!%p165_p2), 96  }
   0x7   : > { %388 = vmatpush3.bf16.msra.mxu0 (!%p165_p2), %v406_v0 }
   0x8   : > { %389 = vmatprep.subr.bf16.mxu0 (!%p165_p2), %v416_v1 }
   0xb   : > { %390 = vmatpush3.bf16.msra.mxu0 (!%p165_p2), %v407_v2 }
   0xd   : > { %s479_s16 = smov (!%p192_p3, %s368_s16), 1 }
   0xe   : > { %s373_s21 = sshll.u32 %s479_s16, 3  ;;  %s374_s27 = sshll.u32 %s479_s16, 2 }
   0xf   : > { %s195_s24 = scalar_lea.vmem %s473_s0, %s373_s21  ;;  %s199_s30 = scalar_lea.vmem %s476_s3, %s374_s27 }
  0x10   : > { %v205_v3 = vld [vmem:[%s195_s24] sm:$0xff]  ;;  %s203_s8 = scalar_lea.vmem %s477_s4, %s374_s27 }
  0x11   : > { %v206_v4 = vpack.c.bf16 %v205_v3, %v205_v3 }
  0x13   : > { %392 = vmatmul.mubr.msk.bf16.vlgmr.msra.gmra.mrb[0].mxu0 %vm230_vm1, %v206_v4 }
  0xe6   : > { %v268_v6 = vpop.f32.mrb[0].mxu0 }
  0xe7   : > { %v269_v7 = vadd.f32 %v376_v5, %v268_v6  ;;  %v393_v8 = vpop.f32.mrb[1].mxu0 }
  0xe8   : > { %v271_v9 = vpop.f32.mrb[2].mxu0 }
  0xe9   : > { %v274_v10 = vpack.c.bf16 %v269_v7, %v269_v7  ;;  %v394_v11 = vpop.f32.mrb[3].mxu0 }
  0xeb   : > { %280 = vrot.lane.b32.xlu0 %v274_v10, %s418_s5  ;;  %276 = vst.msk [vmem:[%s199_s30] sm:$0xf] %vm275_vm2, %v274_v10 }
 0x15d   : > { %v281_v12 = vpop.permute.xlu0 %280 }
 0x15e   : > { %283 = vst.msk [vmem:[%s203_s8] sm:$0xf] %vm275_vm2, %v281_v12 }
 0x15f PF: > { %s15_s15 = sadd.s32 1, %s414_s15  }
 0x160   : > { %p12_p4 = scmp.ge.s32.totalorder %s15_s15, 4  }
 0x162   :  { %14 = sbr.rel (!%p12_p4) target bundleno = 1 (0x1), region = 74 }

// kernel: transformer_decoder.10
= control target key start
LH: loop header
LB: loop body
LE: loop exit
PB: predicated region body
PF: predicated region fallthrough
CT: control target
= control target key end

     0   :  { %s631_s24 = smov 0   ;;  %s689_s0 = inlined_call_operand.vmem [shape: f32[2,8,32], index: 0, kind: input, shape index: {}]   ;;  %s690_s1 = inlined_call_operand.vmem [shape: bf16[32,64], index: 1, kind: input, shape index: {}]   ;;  %s691_s2 = inlined_call_operand.vmem [shape: f32[1,64], index: 2, kind: input, shape index: {}]   ;;  %s692_s3 = inlined_call_operand.vmem [shape: bf16[64,32], index: 3, kind: input, shape index: {}]   ;;  %s693_s4 = inlined_call_operand.vmem [shape: f32[1,32], index: 4, kind: input, shape index: {}]   ;;  %s694_s5 = inlined_call_operand.vmem [shape: f32[1,32], index: 5, kind: input, shape index: {}]   ;;  %s695_s6 = inlined_call_operand.vmem [shape: f32[1,32], index: 6, kind: input, shape index: {}]   ;;  %s696_s7 = inlined_call_operand.vmem [shape: f32[2,8,32], index: 7, kind: output, shape index: {}]  }
   0x1 LB: > { %s514_s25 = sadd.s32 4294967295, %s587_s24   ;;  %p518_p0 = scmp.ge.s32.totalorder %s587_s24, 1  ;;  %s587_s24 = sphi %s631_s24, %s17_s24  }
   0x2   : > { %p236_p1 = scmp.lt.s32.totalorder %s587_s24, 3 }
   0x4   : > { %p237_p2 = pnand %p518_p0, %p236_p1 }
   0x5   : > { %v573_v0 = vld [vmem:[%s690_s1] sm:$0xff] (!%p237_p2)   ;;  %v589_v1 = vmov (!%p237_p2), 0.0   ;;  %v574_v2 = vld [vmem:[%s690_s1 + $0x8] sm:$0xff] (!%p237_p2)   ;;  %vm590_vm0 = vmmov (!%p237_p2), 0   ;;  %p266_p3 = scmp.lt.s32.totalorder (!%p237_p2), %s514_s25, 1  ;;  %vm300_vm1 = vcmask (!%p237_p2), 261120  }
   0x6   : > { %240 = sbr.rel (%p237_p2) target bundleno = 767 (0x2ff), region = 48  ;;  %543 = vmatprep.subr.bf16.mxu0 (!%p237_p2), %v589_v1  ;;  %551 = vmatprep.subr.bf16.mxu1 (!%p237_p2), %v589_v1  ;;  %v575_v3 = vld [vmem:[%s692_s3] sm:$0xff] (!%p237_p2)   ;;  %v576_v4 = vld [vmem:[%s692_s3 + $0x8] sm:$0xff] (!%p237_p2)   ;;  %v577_v7 = vld [vmem:[%s692_s3 + $0x10] sm:$0xff] (!%p237_p2)   ;;  %vm385_vm2 = vcmask (!%p237_p2), 523264  }
   0x7   : > { %544 = vmatpush3.bf16.msra.mxu0 (!%p237_p2), %v573_v0  ;;  %547 = vmatprep.mubr.msk.bf16.mxu0 (!%p237_p2), %vm590_vm0, %v589_v1  ;;  %v578_v8 = vld [vmem:[%s692_s3 + $0x18] sm:$0xff] (!%p237_p2)   ;;  %v521_v9 = vld [vmem:[%s691_s2] ss:$0 sm:$0xff] (!%p237_p2) }
   0x8   : > { %545 = vmatprep.subr.bf16.mxu0 (!%p237_p2), %v589_v1  ;;  %559 = vmatprep.mubr.msk.bf16.mxu1 (!%p237_p2), %vm590_vm0, %v589_v1  ;;  %v525_v17 = vld [vmem:[%s693_s4] ss:$0 sm:$0xff] (!%p237_p2) }
   0x9   : > { %552 = vmatpush3.bf16.msra.mxu1 (!%p237_p2), %v575_v3  ;;  %v531_v34 = vld [vmem:[%s694_s5] ss:$0 sm:$0xff] (!%p237_p2) }
   0xa   : > { %553 = vmatprep.subr.bf16.mxu1 (!%p237_p2), %v589_v1  ;;  %v532_v36 = vld [vmem:[%s695_s6] ss:$0 sm:$0xff] (!%p237_p2) }
   0xb   : > { %546 = vmatpush3.bf16.msra.mxu0 (!%p237_p2), %v574_v2 }
   0xd   : > { %s698_s25 = smov (!%p266_p3, %s514_s25), 1  ;;  %554 = vmatpush3.bf16.msra.mxu1 %v576_v4 }
   0xe   : > { %s519_s11 = sshll.u32 %s698_s25, 3  ;;  %555 = vmatprep.subr.bf16.mxu1 %v589_v1 }
   0xf   : > { %s269_s14 = scalar_lea.vmem %s689_s0, %s519_s11  ;;  %s273_s8 = scalar_lea.vmem %s696_s7, %s519_s11 }
  0x10   : > { %v275_v5 = vld [vmem:[%s269_s14] sm:$0xff] }
  0x11   : > { %v276_v6 = vpack.c.bf16 %v275_v5, %v275_v5  ;;  %556 = vmatpush3.bf16.msra.mxu1 %v577_v7 }
  0x12   : > { %557 = vmatprep.subr.bf16.mxu1 %v589_v1 }
  0x13   : > { %548 = vmatmul.mubr.msk.bf16.vlgmr.msra.gmra.mrb[0].mxu0 %vm300_vm1, %v276_v6 }
  0x15   : > { %558 = vmatpush3.bf16.msra.mxu1 %v578_v8 }
  0xe6   : > { %v338_v10 = vpop.f32.mrb[0].mxu0 }
  0xe7   : > { %v339_v11 = vadd.f32 %v521_v9, %v338_v10  ;;  %v549_v12 = vpop.f32.mrb[1].mxu0 }
  0xe8   : > { %v341_v13 = vpop.f32.mrb[2].mxu0 }
  0xe9   : > { %v344_v14 = vmax.f32 %v339_v11, 0.0  ;;  %v550_v15 = vpop.f32.mrb[3].mxu0 }
  0xeb   : > { %v345_v16 = vpack.c.bf16 %v344_v14, %v344_v14 }
  0xed   : > { %560 = vmatmul.mubr.msk.bf16.vlgmr.msra.gmra.mrb[0].mxu1 %vm385_vm2, %v345_v16 }
 0x1c0   : > { %v423_v18 = vpop.f32.mrb[0].mxu1 }
 0x1c1   : > { %v424_v19 = vadd.f32 %v525_v17, %v423_v18  ;;  %v561_v20 = vpop.f32.mrb[1].mxu1 }
 0x1c2   : > { %v426_v21 = vpop.f32.mrb[2].mxu1 }
 0x1c3   : > { %v562_v22 = vpop.f32.mrb[3].mxu1  ;;  %v431_v23 = vadd.f32 %v424_v19, %v275_v5 }
 0x1c5   : > { %v432_v24 = vsel %vm300_vm1, %v431_v23, 0.0 }
 0x1c6   : > { %433 = vadd.xlane.f32.xlu0 %v432_v24 }
 0x253   : > { %v434_v25 = vpop.xlane.xlu0 %433 }
 0x254   : > { %v436_v26 = vmul.f32 0.03125, %v434_v25 }
 0x256   : > { %v437_v27 = vsub.f32 %v431_v23, %v436_v26 }
 0x258   : > { %v438_v28 = vmul.f32 %v437_v27, %v437_v27 }
 0x25a   : > { %v439_v29 = vsel %vm300_vm1, %v438_v28, 0.0 }
 0x25b   : > { %440 = vadd.xlane.f32.xlu0 %v439_v29 }
 0x2e8   : > { %v441_v30 = vpop.xlane.xlu0 %440 }
 0x2e9   : > { %v442_v31 = vmul.f32 0.03125, %v441_v30 }
 0x2eb   : > { %v443_v32 = vadd.f32 1e-05, %v442_v31 }
 0x2ed   : > { %579 = vrsqrt.f32 %v443_v32 }
 0x2f7   : > { %v580_v33 = vpop.eup %579 }
 0x2f8   : > { %v445_v35 = vmul.f32 %v580_v33, %v437_v27 }
 0x2fa   : > { %v452_v37 = vmul.f32 %v531_v34, %v445_v35 }
 0x2fc   : > { %v459_v38 = vadd.f32 %v532_v36, %v452_v37 }
 0x2fe   : > { %460 = vst.msk [vmem:[%s273_s8] sm:$0xff] %vm300_vm1, %v459_v38 }
 0x2ff PF: > { %s17_s24 = sadd.s32 1, %s587_s24  }
 0x300   : > { %p14_p4 = scmp.ge.s32.totalorder %s17_s24, 4  }
 0x302   :  { %16 = sbr.rel (!%p14_p4) target bundleno = 1 (0x1), region = 78 }

// kernel: transformer_decoder.9
= control target key start
LH: loop header
LB: loop body
LE: loop exit
PB: predicated region body
PF: predicated region fallthrough
CT: control target
= control target key end

     0   :  { %s1335_s13 = smov 0   ;;  %s1476_s0 = inlined_call_operand.vmem [shape: f32[2,8,32], index: 0, kind: input, shape index: {}]   ;;  %s1477_s1 = inlined_call_operand.vmem [shape: bf16[2,8,32], index: 1, kind: input, shape index: {}]   ;;  %s1478_s2 = inlined_call_operand.vmem [shape: bf16[2,8,32], index: 2, kind: input, shape index: {}]   ;;  %s1479_s3 = inlined_call_operand.vmem [shape: bf16[32,32], index: 3, kind: input, shape index: {}]   ;;  %s1480_s4 = inlined_call_operand.vmem [shape: f32[1,32], index: 4, kind: input, shape index: {}]   ;;  %s1481_s5 = inlined_call_operand.vmem [shape: bf16[32,32], index: 5, kind: input, shape index: {}]   ;;  %s1482_s6 = inlined_call_operand.vmem [shape: f32[1,32], index: 6, kind: input, shape index: {}]   ;;  %s1483_s7 = inlined_call_operand.vmem [shape: f32[8,8], index: 7, kind: input, shape index: {}]   ;;  %s1484_s8 = inlined_call_operand.vmem [shape: f32[1,32], index: 8, kind: input, shape index: {}]   ;;  %s1485_s9 = inlined_call_operand.vmem [shape: f32[1,32], index: 9, kind: input, shape index: {}]   ;;  %s1486_s10 = inlined_call_operand.vmem [shape: f32[2,8,32], index: 10, kind: output, shape index: {}]  }
   0x1 LB: > { %s1107_s14 = sadd.s32 4294967295, %s1270_s13   ;;  %p1111_p0 = scmp.ge.s32.totalorder %s1270_s13, 1  ;;  %s1270_s13 = sphi %s1335_s13, %s20_s13  }
   0x2   : > { %p329_p1 = scmp.lt.s32.totalorder %s1270_s13, 3 }
   0x4   : > { %p330_p2 = pnand %p1111_p0, %p329_p1 }
   0x5   : > { %v1240_v0 = vld [vmem:[%s1479_s3] sm:$0xff] (!%p330_p2)   ;;  %v1272_v1 = vmov (!%p330_p2), 0.0   ;;  %v1241_v2 = vld [vmem:[%s1479_s3 + $0x8] sm:$0xff] (!%p330_p2)   ;;  %vm1273_vm0 = vmmov (!%p330_p2), 0   ;;  %p373_p3 = scmp.lt.s32.totalorder (!%p330_p2), %s1107_s14, 1  ;;  %vm415_vm1 = vcmask (!%p330_p2), 261120  }
   0x6   : > { %333 = sbr.rel (%p330_p2) target bundleno = 1759 (0x6df), region = 60  ;;  %1160 = vmatprep.subr.bf16.mxu0 (!%p330_p2), %v1272_v1  ;;  %1168 = vmatprep.subr.bf16.mxu1 (!%p330_p2), %v1272_v1  ;;  %vm467_vm2 = vcmask (!%p330_p2), 64512   ;;  %s1274_s27 = smov (!%p330_p2), 120   ;;  %v1116_v7 = vld [vmem:[%s1480_s4] ss:$0 sm:$0xff] (!%p330_p2)  ;;  %vm531_vm3 = vcmask (!%p330_p2), 1043456  }
   0x7   : > { %1161 = vmatpush3.bf16.msra.mxu0 (!%p330_p2), %v1240_v0  ;;  %1164 = vmatprep.mubr.msk.bf16.mxu0 (!%p330_p2), %vm1273_vm0, %v1272_v1  ;;  %s1275_s28 = smov (!%p330_p2), 112   ;;  %s1276_s11 = smov (!%p330_p2), 104   ;;  %v463_v24 = vld [vmem:[%s1483_s7] sm:$0xff] (!%p330_p2)  ;;  %vm927_vm4 = vcmask (!%p330_p2), 130048   ;;  %vm929_vm5 = vcmask (!%p330_p2), 195584  }
   0x8   : > { %1162 = vmatprep.subr.bf16.mxu0 (!%p330_p2), %v1272_v1  ;;  %1170 = vmatprep.mubr.msk.bf16.mxu1 (!%p330_p2), %vm1273_vm0, %v1272_v1  ;;  %s1277_s22 = smov (!%p330_p2), 8   ;;  %s1278_s25 = smov (!%p330_p2), 16  }
   0xb   : > { %1163 = vmatpush3.bf16.msra.mxu0 (!%p330_p2), %v1241_v2 }
   0xc   : > { %1174 = vmatprep.subr.bf16.mxu0 (!%p330_p2), %v1272_v1 }
   0xd   : > { %s1488_s14 = smov (!%p373_p3, %s1107_s14), 1 }
   0xe   : > { %s1112_s19 = sshll.u32 %s1488_s14, 3  ;;  %s1113_s20 = sshll.u32 %s1488_s14, 2 }
   0xf   : > { %s376_s23 = scalar_lea.vmem %s1476_s0, %s1112_s19  ;;  %s380_s26 = scalar_lea.vmem %s1477_s1, %s1113_s20 }
  0x10   : > { %v1366_v3 = vld [vmem:[%s376_s23] sm:$0xff]  ;;  %s1416_s18 = scalar_lea.vmem %s1478_s2, %s1113_s20  ;;  %s388_s17 = scalar_lea.vmem %s1486_s10, %s1112_s19 }
  0x11   : > { %v391_v4 = vpack.c.bf16 %v1366_v3, %v1366_v3  ;;  %v1242_v5 = vld [vmem:[%s380_s26] ss:$0 sps:$4 sm:$0xff]   ;;  %s1279_s26 = smov 24  }
  0x12   : > { %579 = vrot.lane.b32.xlu0 %v1242_v5, %s1274_s27  ;;  %v472_v6 = vsel %vm467_vm2, %v1242_v5, 0  ;;  %692 = vrot.lane.b32.xlu1 %v1242_v5, %s1275_s28  ;;  %v1243_v57 = vld [vmem:[%s1416_s18] ss:$0 sps:$4 sm:$0xff]  }
  0x13   : > { %1165 = vmatmul.mubr.msk.bf16.vlgmr.msra.gmra.mrb[0].mxu0 %vm415_vm1, %v391_v4  ;;  %1169 = vmatpush3.bf16.xpose.msra.mxu1 %v472_v6  ;;  %v533_v58 = vsel %vm531_vm3, %v1243_v57, 0 }
  0x14   : > { %1176 = vmatprep.mubr.msk.bf16.mxu0 %vm1273_vm0, %v1272_v1  ;;  %1180 = vmatprep.subr.bf16.mxu1 %v1272_v1 }
  0x15   : > { %1175 = vmatpush3.bf16.msra.mxu0 %v533_v58  ;;  %v1130_v58 = vld [vmem:[%s1482_s6] ss:$0 sm:$0xff] }
  0x16   : > { %1186 = vmatprep.subr.bf16.mxu0 %v1272_v1 }
  0x84   : > { %v580_v11 = vpop.permute.xlu0 %579  ;;  %v693_v16 = vpop.permute.xlu1 %692 }
  0x85   : > { %v585_v15 = vsel %vm467_vm2, %v580_v11, 0  ;;  %v698_v17 = vsel %vm467_vm2, %v693_v16, 0 }
  0xe6   : > { %v453_v8 = vpop.f32.mrb[0].mxu0 }
  0xe7   : > { %v454_v9 = vadd.f32 %v1116_v7, %v453_v8  ;;  %v1166_v10 = vpop.f32.mrb[1].mxu0 }
  0xe8   : > { %v456_v12 = vpop.f32.mrb[2].mxu0 }
  0xe9   : > { %v464_v13 = vpack.c.bf16 %v454_v9, %v454_v9  ;;  %v1167_v14 = vpop.f32.mrb[3].mxu0 }
  0xeb   : > { %690 = vrot.lane.b32.xlu1 %v464_v13, %s1275_s28  ;;  %576 = vrot.lane.b32.xlu0 %v464_v13, %s1274_s27 }
  0xec   : > { %1171 = vmatmul.mubr.msk.bf16.vlgmr.msra.gmra.mrb[0].mxu1 %vm467_vm2, %v464_v13 }
  0xed   : > { %1181 = vmatpush3.bf16.xpose.msra.mxu1 %v585_v15  ;;  %1182 = vmatprep.mubr.msk.bf16.mxu1 %vm1273_vm0, %v1272_v1 }
  0xee   : > { %1192 = vmatprep.subr.bf16.mxu1 %v1272_v1 }
  0xef   : > { %802 = vrot.lane.b32.xlu1 %v464_v13, %s1276_s11  ;;  %804 = vrot.lane.b32.xlu0 %v1242_v5, %s1276_s11 }
 0x15d   : > { %v577_v18 = vpop.permute.xlu0 %576  ;;  %v691_v21 = vpop.permute.xlu1 %690 }
 0x15e   : > { %1183 = vmatmul.mubr.msk.bf16.vlgmr.msra.gmra.mrb[4].mxu1 %vm467_vm2, %v577_v18 }
 0x15f   : > { %1193 = vmatpush3.bf16.xpose.msra.mxu1 %v698_v17  ;;  %1194 = vmatprep.mubr.msk.bf16.mxu1 %vm1273_vm0, %v1272_v1 }
 0x160   : > { %1204 = vmatprep.subr.bf16.mxu1 %v1272_v1 }
 0x161   : > { %v805_v19 = vpop.permute.xlu0 %804  ;;  %v803_v22 = vpop.permute.xlu1 %802 }
 0x162   : > { %v810_v20 = vsel %vm467_vm2, %v805_v19, 0 }
 0x166   : > { %1195 = vmatmul.mubr.msk.bf16.vlgmr.msra.gmra.mrb[8].mxu1 %vm467_vm2, %v691_v21 }
 0x167   : > { %1205 = vmatpush3.bf16.xpose.msra.mxu1 %v810_v20  ;;  %1206 = vmatprep.mubr.msk.bf16.mxu1 %vm1273_vm0, %v1272_v1 }
 0x168   : > { %1216 = vmatprep.subr.bf16.mxu1 %v1272_v1 }
 0x16e   : > { %1207 = vmatmul.mubr.msk.bf16.vlgmr.msra.gmra.mrb[12].mxu1 %vm467_vm2, %v803_v22 }
 0x16f   : > { %1220 = vmatprep.mubr.msk.bf16.mxu1 %vm1273_vm0, %v1272_v1 }
 0x1bf   : > { %v508_v23 = vpop.f32.mrb[0].mxu1 }
 0x1c0   : > { %v514_v25 = vmul.f32 0.35355338, %v508_v23  ;;  %v1172_v26 = vpop.f32.mrb[1].mxu1 }
 0x1c1   : > { %v511_v27 = vpop.f32.mrb[2].mxu1 }
 0x1c2   : > { %v1173_v28 = vpop.f32.mrb[3].mxu1  ;;  %v515_v29 = vadd.f32 %v514_v25, %v463_v24 }
 0x1c4   : > { %v516_v30 = vsel %vm467_vm2, %v515_v29, -inf }
 0x1c5   : > { %517 = vmax.xlane.f32.xlu0 %v516_v30 }
 0x231   : > { %v621_v31 = vpop.f32.mrb[4].mxu1 }
 0x232   : > { %v627_v32 = vmul.f32 0.35355338, %v621_v31  ;;  %v1184_v33 = vpop.f32.mrb[5].mxu1 }
 0x233   : > { %v624_v34 = vpop.f32.mrb[6].mxu1 }
 0x234   : > { %v1185_v35 = vpop.f32.mrb[7].mxu1  ;;  %v628_v36 = vadd.f32 %v627_v32, %v463_v24 }
 0x236   : > { %v629_v37 = vsel %vm467_vm2, %v628_v36, -inf }
 0x237   : > { %630 = vmax.xlane.f32.xlu1 %v629_v37 }
 0x239   : > { %v734_v38 = vpop.f32.mrb[8].mxu1 }
 0x23a   : > { %v740_v39 = vmul.f32 0.35355338, %v734_v38  ;;  %v1196_v40 = vpop.f32.mrb[9].mxu1  ;;  %v1244_v38 = vld [vmem:[%s1481_s5] sm:$0xff]  }
 0x23b   : > { %v737_v41 = vpop.f32.mrb[10].mxu1  ;;  %1217 = vmatpush3.bf16.msra.mxu1 %v1244_v38 }
 0x23c   : > { %v1197_v42 = vpop.f32.mrb[11].mxu1  ;;  %v741_v43 = vadd.f32 %v740_v39, %v463_v24  ;;  %1218 = vmatprep.subr.bf16.mxu1 %v1272_v1 }
 0x23e   : > { %v742_v44 = vsel %vm467_vm2, %v741_v43, -inf }
 0x23f   : > { %743 = vmax.xlane.f32.xlu0 %v742_v44 }
 0x241   : > { %v846_v45 = vpop.f32.mrb[12].mxu1 }
 0x242   : > { %v852_v46 = vmul.f32 0.35355338, %v846_v45  ;;  %v1208_v47 = vpop.f32.mrb[13].mxu1 }
 0x243   : > { %v849_v48 = vpop.f32.mrb[14].mxu1 }
 0x244   : > { %v1209_v49 = vpop.f32.mrb[15].mxu1  ;;  %v853_v50 = vadd.f32 %v852_v46, %v463_v24 }
 0x246   : > { %v854_v51 = vsel %vm467_vm2, %v853_v50, -inf }
 0x247   : > { %855 = vmax.xlane.f32.xlu0 %v854_v51 }
 0x252   : > { %v518_v52 = vpop.xlane.xlu0 %517 }
 0x253   : > { %v519_v53 = vsub.f32 %v515_v29, %v518_v52 }
 0x255   : > { %v520_v54 = vmul.f32 1.442695, %v519_v53 }
 0x257   : > { %1246 = vpow2.f32 %v520_v54 }
 0x261   : > { %v1247_v55 = vpop.eup %1246 }
 0x262   : > { %v522_v56 = vsel %vm467_vm2, %v1247_v55, 0.0 }
 0x263   : > { %523 = vadd.xlane.f32.xlu1 %v522_v56 }
 0x274   : > { %642 = vrot.lane.b32.xlu1 %v1243_v57, %s1274_s27 }
 0x2c4   : > { %v631_v59 = vpop.xlane.xlu1 %630 }
 0x2c5   : > { %v632_v60 = vsub.f32 %v628_v36, %v631_v59 }
 0x2c7   : > { %v633_v61 = vmul.f32 1.442695, %v632_v60 }
 0x2c9   : > { %1248 = vpow2.f32 %v633_v61 }
 0x2cc   : > { %v744_v62 = vpop.xlane.xlu0 %743 }
 0x2cd   : > { %v745_v63 = vsub.f32 %v741_v43, %v744_v62  ;;  %v1245_v43 = vld [vmem:[%s1481_s5 + $0x8] sm:$0xff]  }
 0x2ce   : > { %1219 = vmatpush3.bf16.msra.mxu1 %v1245_v43 }
 0x2cf   : > { %v746_v0 = vmul.f32 1.442695, %v745_v63 }
 0x2d1   : > { %1250 = vpow2.f32 %v746_v0 }
 0x2d3   : > { %v1249_v2 = vpop.eup %1248 }
 0x2d4   : > { %v856_v4 = vpop.xlane.xlu0 %855  ;;  %v635_v5 = vsel %vm467_vm2, %v1249_v2, 0.0 }
 0x2d5   : > { %v857_v6 = vsub.f32 %v853_v50, %v856_v4  ;;  %636 = vadd.xlane.f32.xlu0 %v635_v5 }
 0x2d7   : > { %v858_v7 = vmul.f32 1.442695, %v857_v6 }
 0x2d9   : > { %1252 = vpow2.f32 %v858_v7 }
 0x2db   : > { %v1251_v8 = vpop.eup %1250 }
 0x2dc   : > { %v748_v9 = vsel %vm467_vm2, %v1251_v8, 0.0 }
 0x2dd   : > { %749 = vadd.xlane.f32.xlu1 %v748_v9 }
 0x2e3   : > { %v1253_v10 = vpop.eup %1252 }
 0x2e4   : > { %v860_v11 = vsel %vm467_vm2, %v1253_v10, 0.0 }
 0x2e5   : > { %861 = vadd.xlane.f32.xlu0 %v860_v11 }
 0x2ee   : > { %866 = vrot.lane.b32.xlu1 %v1243_v57, %s1276_s11 }
 0x2f0   : > { %v524_v12 = vpop.xlane.xlu1 %523 }
 0x2f1   : > { %1254 = vrcp.f32 %v524_v12 }
 0x2f4   : > { %v643_v14 = vpop.permute.xlu1 %642 }
 0x2f5   : > { %v648_v17 = vsel %vm531_vm3, %v643_v14, 0  ;;  %v1135_v14 = vld [vmem:[%s1485_s9] ss:$0 sm:$0xff] }
 0x2fb   : > { %v1255_v13 = vpop.eup %1254  ;;  %754 = vrot.lane.b32.xlu0 %v1243_v57, %s1275_s28 }
 0x2fc   : > { %v526_v15 = vmul.f32 %v1255_v13, %v1247_v55 }
 0x2fe   : > { %v527_v16 = vpack.c.bf16 %v526_v15, %v526_v15 }
 0x300   : > { %1177 = vmatmul.mubr.msk.bf16.vlgmr.msra.gmra.mrb[4].mxu0 %vm467_vm2, %v527_v16 }
 0x301   : > { %1187 = vmatpush3.bf16.msra.mxu0 %v648_v17  ;;  %1188 = vmatprep.mubr.msk.bf16.mxu0 %vm1273_vm0, %v1272_v1 }
 0x302   : > { %1198 = vmatprep.subr.bf16.mxu0 %v1272_v1 }
 0x362   : > { %v637_v18 = vpop.xlane.xlu0 %636 }
 0x363   : > { %1256 = vrcp.f32 %v637_v18 }
 0x36a   : > { %v750_v19 = vpop.xlane.xlu1 %749 }
 0x36b   : > { %1258 = vrcp.f32 %v750_v19 }
 0x36d   : > { %v1257_v20 = vpop.eup %1256 }
 0x36e   : > { %v639_v21 = vmul.f32 %v1257_v20, %v1249_v2  ;;  %v867_v27 = vpop.permute.xlu1 %866 }
 0x36f   : > { %v872_v30 = vsel %vm531_vm3, %v867_v27, 0 }
 0x370   : > { %v640_v22 = vpack.c.bf16 %v639_v21, %v639_v21 }
 0x372   : > { %1189 = vmatmul.mubr.msk.bf16.vlgmr.msra.gmra.mrb[8].mxu0 %vm467_vm2, %v640_v22  ;;  %v862_v23 = vpop.xlane.xlu0 %861 }
 0x373   : > { %1260 = vrcp.f32 %v862_v23  ;;  %1200 = vmatprep.mubr.msk.bf16.mxu0 %vm1273_vm0, %v1272_v1 }
 0x375   : > { %v1259_v24 = vpop.eup %1258 }
 0x376   : > { %v752_v25 = vmul.f32 %v1259_v24, %v1251_v8  ;;  %v755_v26 = vpop.permute.xlu0 %754 }
 0x377   : > { %v760_v28 = vsel %vm531_vm3, %v755_v26, 0 }
 0x378   : > { %1199 = vmatpush3.bf16.msra.mxu0 %v760_v28  ;;  %v753_v29 = vpack.c.bf16 %v752_v25, %v752_v25 }
 0x379   : > { %1210 = vmatprep.subr.bf16.mxu0 %v1272_v1 }
 0x37b   : > { %1201 = vmatmul.mubr.msk.bf16.vlgmr.msra.gmra.mrb[12].mxu0 %vm467_vm2, %v753_v29 }
 0x37c   : > { %1211 = vmatpush3.bf16.msra.mxu0 %v872_v30  ;;  %1212 = vmatprep.mubr.msk.bf16.mxu0 %vm1273_vm0, %v1272_v1 }
 0x37d   : > { %v1261_v31 = vpop.eup %1260 }
 0x37e   : > { %v864_v32 = vmul.f32 %v1261_v31, %v1253_v10 }
 0x380   : > { %v865_v33 = vpack.c.bf16 %v864_v32, %v864_v32 }
 0x383   : > { %1213 = vmatmul.mubr.msk.bf16.vlgmr.msra.gmra.mrb[16].mxu0 %vm467_vm2, %v865_v33 }
 0x3d3   : > { %v569_v34 = vpop.f32.mrb[4].mxu0 }
 0x3d4   : > { %v1178_v35 = vpop.f32.mrb[5].mxu0 }
 0x3d5   : > { %v572_v36 = vpop.f32.mrb[6].mxu0 }
 0x3d6   : > { %v1179_v37 = vpop.f32.mrb[7].mxu0 }
 0x445   : > { %v684_v39 = vpop.f32.mrb[8].mxu0 }
 0x446   : > { %915 = vrot.lane.b32.xlu1 %v684_v39, %s1277_s22  ;;  %v1190_v40 = vpop.f32.mrb[9].mxu0 }
 0x447   : > { %v687_v41 = vpop.f32.mrb[10].mxu0 }
 0x448   : > { %v1191_v42 = vpop.f32.mrb[11].mxu0 }
 0x44e   : > { %v796_v44 = vpop.f32.mrb[12].mxu0 }
 0x44f   : > { %919 = vrot.lane.b32.xlu0 %v796_v44, %s1278_s25  ;;  %v1202_v45 = vpop.f32.mrb[13].mxu0 }
 0x450   : > { %v799_v46 = vpop.f32.mrb[14].mxu0 }
 0x451   : > { %v1203_v47 = vpop.f32.mrb[15].mxu0 }
 0x456   : > { %v908_v48 = vpop.f32.mrb[16].mxu0 }
 0x457   : > { %923 = vrot.lane.b32.xlu1 %v908_v48, %s1279_s26  ;;  %v1214_v1 = vpop.f32.mrb[17].mxu0 }
 0x458   : > { %v911_v49 = vpop.f32.mrb[18].mxu0 }
 0x459   : > { %v1215_v50 = vpop.f32.mrb[19].mxu0 }
 0x4b8   : > { %v916_v51 = vpop.permute.xlu1 %915 }
 0x4b9   : > { %v926_v53 = vsel %vm467_vm2, %v569_v34, %v916_v51 }
 0x4c1   : > { %v920_v52 = vpop.permute.xlu0 %919 }
 0x4c2   : > { %v928_v54 = vsel %vm927_vm4, %v926_v53, %v920_v52 }
 0x4c9   : > { %v924_v55 = vpop.permute.xlu1 %923 }
 0x4ca   : > { %v930_v56 = vsel %vm929_vm5, %v928_v54, %v924_v55 }
 0x4cb   : > { %v931_v57 = vpack.c.bf16 %v930_v56, %v930_v56 }
 0x4cd   : > { %1221 = vmatmul.mubr.msk.bf16.vlgmr.msra.gmra.mrb[16].mxu1 %vm415_vm1, %v931_v57 }
 0x5a0   : > { %v992_v59 = vpop.f32.mrb[16].mxu1 }
 0x5a1   : > { %v993_v60 = vadd.f32 %v1130_v58, %v992_v59  ;;  %v1222_v61 = vpop.f32.mrb[17].mxu1 }
 0x5a2   : > { %v995_v62 = vpop.f32.mrb[18].mxu1 }
 0x5a3   : > { %v1223_v63 = vpop.f32.mrb[19].mxu1  ;;  %v1000_v0 = vadd.f32 %v993_v60, %v1366_v3  ;;  %v1134_v3 = vld [vmem:[%s1484_s8] ss:$0 sm:$0xff] }
 0x5a5   : > { %v1001_v2 = vsel %vm415_vm1, %v1000_v0, 0.0 }
 0x5a6   : > { %1002 = vadd.xlane.f32.xlu0 %v1001_v2 }
 0x633   : > { %v1003_v4 = vpop.xlane.xlu0 %1002 }
 0x634   : > { %v1005_v5 = vmul.f32 0.03125, %v1003_v4 }
 0x636   : > { %v1006_v6 = vsub.f32 %v1000_v0, %v1005_v5 }
 0x638   : > { %v1007_v7 = vmul.f32 %v1006_v6, %v1006_v6 }
 0x63a   : > { %v1008_v8 = vsel %vm415_vm1, %v1007_v7, 0.0 }
 0x63b   : > { %1009 = vadd.xlane.f32.xlu1 %v1008_v8 }
 0x6c8   : > { %v1010_v9 = vpop.xlane.xlu1 %1009 }
 0x6c9   : > { %v1011_v10 = vmul.f32 0.03125, %v1010_v9 }
 0x6cb   : > { %v1012_v11 = vadd.f32 1e-05, %v1011_v10 }
 0x6cd   : > { %1262 = vrsqrt.f32 %v1012_v11 }
 0x6d7   : > { %v1263_v12 = vpop.eup %1262 }
 0x6d8   : > { %v1014_v13 = vmul.f32 %v1263_v12, %v1006_v6 }
 0x6da   : > { %v1021_v15 = vmul.f32 %v1134_v3, %v1014_v13 }
 0x6dc   : > { %v1028_v16 = vadd.f32 %v1135_v14, %v1021_v15 }
 0x6de   : > { %1029 = vst.msk [vmem:[%s388_s17] sm:$0xff] %vm415_vm1, %v1028_v16 }
 0x6df PF: > { %s20_s13 = sadd.s32 1, %s1270_s13  }
 0x6e0   : > { %p17_p4 = scmp.ge.s32.totalorder %s20_s13, 4  }
 0x6e2   :  { %19 = sbr.rel (!%p17_p4) target bundleno = 1 (0x1), region = 96 }

// kernel: transformer_decoder.8
= control target key start
LH: loop header
LB: loop body
LE: loop exit
PB: predicated region body
PF: predicated region fallthrough
CT: control target
= control target key end

     0   :  { %s1219_s27 = smov 0   ;;  %s1351_s0 = inlined_call_operand.vmem [shape: f32[2,8,32], index: 0, kind: input, shape index: {}]   ;;  %s1352_s1 = inlined_call_operand.vmem [shape: bf16[32,96], index: 1, kind: input, shape index: {}]   ;;  %s1353_s2 = inlined_call_operand.vmem [shape: f32[1,96], index: 2, kind: input, shape index: {}]   ;;  %s1354_s3 = inlined_call_operand.vmem [shape: bf16[32,32], index: 3, kind: input, shape index: {}]   ;;  %s1355_s4 = inlined_call_operand.vmem [shape: f32[1,32], index: 4, kind: input, shape index: {}]   ;;  %s1356_s5 = inlined_call_operand.vmem [shape: f32[8,8], index: 5, kind: input, shape index: {}]   ;;  %s1357_s6 = inlined_call_operand.vmem [shape: f32[1,32], index: 6, kind: input, shape index: {}]   ;;  %s1358_s7 = inlined_call_operand.vmem [shape: f32[1,32], index: 7, kind: input, shape index: {}]   ;;  %s1359_s8 = inlined_call_operand.vmem [shape: f32[2,8,32], index: 8, kind: output, shape index: {}]  }
   0x1 LB: > { %s991_s28 = sadd.s32 4294967295, %s1156_s27   ;;  %p995_p0 = scmp.ge.s32.totalorder %s1156_s27, 1  ;;  %s1156_s27 = sphi %s1219_s27, %s18_s27  }
   0x2   : > { %p261_p1 = scmp.lt.s32.totalorder %s1156_s27, 3 }
   0x4   : > { %p262_p2 = pnand %p995_p0, %p261_p1 }
   0x5   : > { %v1128_v0 = vld [vmem:[%s1352_s1] sm:$0xff] (!%p262_p2)   ;;  %v1158_v1 = vmov (!%p262_p2), 0.0   ;;  %v1129_v2 = vld [vmem:[%s1352_s1 + $0x8] sm:$0xff] (!%p262_p2)   ;;  %vm1159_vm0 = vmmov (!%p262_p2), 0   ;;  %p293_p3 = scmp.lt.s32.totalorder (!%p262_p2), %s991_s28, 1  ;;  %vm327_vm1 = vcmask (!%p262_p2), 261120  }
   0x6   : > { %265 = sbr.rel (%p262_p2) target bundleno = 1812 (0x714), region = 52  ;;  %1040 = vmatprep.subr.bf16.mxu0 (!%p262_p2), %v1158_v1  ;;  %1048 = vmatprep.subr.bf16.mxu1 (!%p262_p2), %v1158_v1  ;;  %v998_v5 = vld [vmem:[%s1353_s2] ss:$0 sm:$0xff] (!%p262_p2)  ;;  %s1160_s17 = smov (!%p262_p2), 120   ;;  %vm376_vm2 = vcmask (!%p262_p2), 64512   ;;  %vm442_vm3 = vcmask (!%p262_p2), 1043456  }
   0x7   : > { %1041 = vmatpush3.bf16.msra.mxu0 (!%p262_p2), %v1128_v0  ;;  %1044 = vmatprep.mubr.msk.bf16.mxu0 (!%p262_p2), %vm1159_vm0, %v1158_v1  ;;  %s1161_s18 = smov (!%p262_p2), 96   ;;  %s1162_s19 = smov (!%p262_p2), 80   ;;  %v371_v24 = vld [vmem:[%s1356_s5] sm:$0xff] (!%p262_p2)  ;;  %vm835_vm4 = vcmask (!%p262_p2), 130048   ;;  %vm837_vm5 = vcmask (!%p262_p2), 195584  }
   0x8   : > { %1042 = vmatprep.subr.bf16.mxu0 (!%p262_p2), %v1158_v1  ;;  %1050 = vmatprep.mubr.msk.bf16.mxu1 (!%p262_p2), %vm1159_vm0, %v1158_v1  ;;  %s1163_s20 = smov (!%p262_p2), 88   ;;  %s1164_s21 = smov (!%p262_p2), 72  }
   0x9   : > { %s1165_s22 = smov (!%p262_p2), 112   ;;  %s1166_s23 = smov (!%p262_p2), 104  }
   0xa   : > { %s1167_s26 = smov (!%p262_p2), 56   ;;  %s1168_s29 = smov (!%p262_p2), 64  }
   0xb   : > { %1043 = vmatpush3.bf16.msra.mxu0 (!%p262_p2), %v1129_v2  ;;  %s1169_s30 = smov (!%p262_p2), 40   ;;  %s1170_s9 = smov (!%p262_p2), 48  }
   0xc   : > { %1054 = vmatprep.subr.bf16.mxu0 (!%p262_p2), %v1158_v1  ;;  %s1171_s10 = smov (!%p262_p2), 8   ;;  %s1172_s16 = smov (!%p262_p2), 16  }
   0xd   : > { %s1361_s28 = smov (!%p293_p3, %s991_s28), 1 }
   0xe   : > { %s996_s11 = sshll.u32 %s1361_s28, 3 }
   0xf   : > { %s296_s14 = scalar_lea.vmem %s1351_s0, %s996_s11 }
  0x10   : > { %v1249_v3 = vld [vmem:[%s296_s14] sm:$0xff] }
  0x11   : > { %v303_v4 = vpack.c.bf16 %v1249_v3, %v1249_v3 }
  0x13   : > { %1045 = vmatmul.mubr.msk.bf16.vlgmr.msra.gmra.mrb[0].mxu0 %vm327_vm1, %v303_v4 }
  0x14   : > { %1056 = vmatprep.mubr.msk.bf16.mxu0 %vm1159_vm0, %v1158_v1 }
  0xe6   : > { %v365_v6 = vpop.f32.mrb[0].mxu0 }
  0xe7   : > { %v366_v7 = vadd.f32 %v998_v5, %v365_v6  ;;  %v1046_v8 = vpop.f32.mrb[1].mxu0 }
  0xe8   : > { %v368_v9 = vpop.f32.mrb[2].mxu0 }
  0xe9   : > { %v1259_v10 = vpack.c.bf16 %v366_v7, %v366_v7  ;;  %v1047_v11 = vpop.f32.mrb[3].mxu0 }
  0xeb   : > { %486 = vrot.lane.b32.xlu1 %v1259_v10, %s1160_s17  ;;  %374 = vrot.lane.b32.xlu0 %v1259_v10, %s1161_s18  ;;  %s1173_s17 = smov 24  }
  0xef   : > { %600 = vrot.lane.b32.xlu1 %v1259_v10, %s1162_s19  ;;  %488 = vrot.lane.b32.xlu0 %v1259_v10, %s1163_s20 }
  0xf3   : > { %712 = vrot.lane.b32.xlu1 %v1259_v10, %s1164_s21  ;;  %598 = vrot.lane.b32.xlu0 %v1259_v10, %s1165_s22 }
  0xf7   : > { %710 = vrot.lane.b32.xlu0 %v1259_v10, %s1166_s23 }
 0x15d   : > { %v375_v12 = vpop.permute.xlu0 %374  ;;  %v487_v15 = vpop.permute.xlu1 %486 }
 0x15e   : > { %v381_v13 = vsel %vm376_vm2, %v375_v12, 0 }
 0x15f   : > { %1049 = vmatpush3.bf16.xpose.msra.mxu1 %v381_v13 }
 0x160   : > { %1060 = vmatprep.subr.bf16.mxu1 %v1158_v1 }
 0x161   : > { %v489_v14 = vpop.permute.xlu0 %488  ;;  %v601_v17 = vpop.permute.xlu1 %600 }
 0x162   : > { %v494_v16 = vsel %vm376_vm2, %v489_v14, 0  ;;  %v606_v18 = vsel %vm376_vm2, %v601_v17, 0 }
 0x165   : > { %v713_v19 = vpop.permute.xlu1 %712  ;;  %v599_v20 = vpop.permute.xlu0 %598 }
 0x166   : > { %1051 = vmatmul.mubr.msk.bf16.vlgmr.msra.gmra.mrb[0].mxu1 %vm376_vm2, %v1259_v10  ;;  %v718_v21 = vsel %vm376_vm2, %v713_v19, 0 }
 0x167   : > { %1061 = vmatpush3.bf16.xpose.msra.mxu1 %v494_v16  ;;  %1062 = vmatprep.mubr.msk.bf16.mxu1 %vm1159_vm0, %v1158_v1 }
 0x168   : > { %1072 = vmatprep.subr.bf16.mxu1 %v1158_v1 }
 0x169   : > { %v711_v22 = vpop.permute.xlu0 %710 }
 0x16e   : > { %1063 = vmatmul.mubr.msk.bf16.vlgmr.msra.gmra.mrb[4].mxu1 %vm376_vm2, %v487_v15 }
 0x16f   : > { %1073 = vmatpush3.bf16.xpose.msra.mxu1 %v606_v18  ;;  %1074 = vmatprep.mubr.msk.bf16.mxu1 %vm1159_vm0, %v1158_v1 }
 0x170   : > { %1084 = vmatprep.subr.bf16.mxu1 %v1158_v1 }
 0x176   : > { %1075 = vmatmul.mubr.msk.bf16.vlgmr.msra.gmra.mrb[8].mxu1 %vm376_vm2, %v599_v20 }
 0x177   : > { %1085 = vmatpush3.bf16.xpose.msra.mxu1 %v718_v21  ;;  %1086 = vmatprep.mubr.msk.bf16.mxu1 %vm1159_vm0, %v1158_v1 }
 0x178   : > { %1096 = vmatprep.subr.bf16.mxu1 %v1158_v1 }
 0x17e   : > { %1087 = vmatmul.mubr.msk.bf16.vlgmr.msra.gmra.mrb[12].mxu1 %vm376_vm2, %v711_v22 }
 0x17f   : > { %1100 = vmatprep.mubr.msk.bf16.mxu1 %vm1159_vm0, %v1158_v1 }
 0x239   : > { %v417_v23 = vpop.f32.mrb[0].mxu1 }
 0x23a   : > { %v423_v25 = vmul.f32 0.35355338, %v417_v23  ;;  %v1052_v26 = vpop.f32.mrb[1].mxu1 }
 0x23b   : > { %v420_v27 = vpop.f32.mrb[2].mxu1 }
 0x23c   : > { %v1053_v28 = vpop.f32.mrb[3].mxu1  ;;  %v424_v29 = vadd.f32 %v423_v25, %v371_v24 }
 0x23e   : > { %v425_v30 = vsel %vm376_vm2, %v424_v29, -inf }
 0x23f   : > { %426 = vmax.xlane.f32.xlu1 %v425_v30 }
 0x241   : > { %v530_v31 = vpop.f32.mrb[4].mxu1 }
 0x242   : > { %v536_v32 = vmul.f32 0.35355338, %v530_v31  ;;  %v1064_v33 = vpop.f32.mrb[5].mxu1 }
 0x243   : > { %v533_v34 = vpop.f32.mrb[6].mxu1 }
 0x244   : > { %v1065_v35 = vpop.f32.mrb[7].mxu1  ;;  %v537_v36 = vadd.f32 %v536_v32, %v371_v24 }
 0x246   : > { %v538_v37 = vsel %vm376_vm2, %v537_v36, -inf }
 0x247   : > { %539 = vmax.xlane.f32.xlu0 %v538_v37 }
 0x249   : > { %v642_v38 = vpop.f32.mrb[8].mxu1 }
 0x24a   : > { %v648_v39 = vmul.f32 0.35355338, %v642_v38  ;;  %v1076_v40 = vpop.f32.mrb[9].mxu1 }
 0x24b   : > { %v645_v41 = vpop.f32.mrb[10].mxu1 }
 0x24c   : > { %v1077_v42 = vpop.f32.mrb[11].mxu1  ;;  %v649_v43 = vadd.f32 %v648_v39, %v371_v24 }
 0x24d   : > { %v1130_v42 = vld [vmem:[%s1354_s3] sm:$0xff]  }
 0x24e   : > { %v650_v44 = vsel %vm376_vm2, %v649_v43, -inf  ;;  %1097 = vmatpush3.bf16.msra.mxu1 %v1130_v42 }
 0x24f   : > { %651 = vmax.xlane.f32.xlu0 %v650_v44  ;;  %1098 = vmatprep.subr.bf16.mxu1 %v1158_v1 }
 0x251   : > { %v754_v45 = vpop.f32.mrb[12].mxu1 }
 0x252   : > { %v760_v46 = vmul.f32 0.35355338, %v754_v45  ;;  %v1088_v47 = vpop.f32.mrb[13].mxu1 }
 0x253   : > { %v757_v48 = vpop.f32.mrb[14].mxu1 }
 0x254   : > { %v1089_v49 = vpop.f32.mrb[15].mxu1  ;;  %v761_v50 = vadd.f32 %v760_v46, %v371_v24 }
 0x256   : > { %v762_v51 = vsel %vm376_vm2, %v761_v50, -inf }
 0x257   : > { %763 = vmax.xlane.f32.xlu1 %v762_v51 }
 0x2cc   : > { %v427_v52 = vpop.xlane.xlu1 %426 }
 0x2cd   : > { %v428_v53 = vsub.f32 %v424_v29, %v427_v52 }
 0x2cf   : > { %v429_v54 = vmul.f32 1.442695, %v428_v53 }
 0x2d1   : > { %1132 = vpow2.f32 %v429_v54 }
 0x2d4   : > { %v540_v55 = vpop.xlane.xlu0 %539 }
 0x2d5   : > { %v541_v56 = vsub.f32 %v537_v36, %v540_v55 }
 0x2d7   : > { %v542_v57 = vmul.f32 1.442695, %v541_v56 }
 0x2d9   : > { %1134 = vpow2.f32 %v542_v57 }
 0x2db   : > { %v1133_v58 = vpop.eup %1132 }
 0x2dc   : > { %v652_v59 = vpop.xlane.xlu0 %651  ;;  %v431_v60 = vsel %vm376_vm2, %v1133_v58, 0.0 }
 0x2dd   : > { %v653_v61 = vsub.f32 %v649_v43, %v652_v59  ;;  %432 = vadd.xlane.f32.xlu0 %v431_v60  ;;  %v1131_v43 = vld [vmem:[%s1354_s3 + $0x8] sm:$0xff]  }
 0x2de   : > { %1099 = vmatpush3.bf16.msra.mxu1 %v1131_v43 }
 0x2df   : > { %v654_v62 = vmul.f32 1.442695, %v653_v61 }
 0x2e1   : > { %1136 = vpow2.f32 %v654_v62 }
 0x2e3   : > { %v1135_v63 = vpop.eup %1134 }
 0x2e4   : > { %v544_v0 = vsel %vm376_vm2, %v1135_v63, 0.0  ;;  %v764_v5 = vpop.xlane.xlu1 %763 }
 0x2e5   : > { %545 = vadd.xlane.f32.xlu1 %v544_v0  ;;  %v765_v6 = vsub.f32 %v761_v50, %v764_v5 }
 0x2e7   : > { %v766_v7 = vmul.f32 1.442695, %v765_v6 }
 0x2e9   : > { %1138 = vpow2.f32 %v766_v7 }
 0x2eb   : > { %v1137_v2 = vpop.eup %1136 }
 0x2ec   : > { %v656_v4 = vsel %vm376_vm2, %v1137_v2, 0.0 }
 0x2ed   : > { %657 = vadd.xlane.f32.xlu0 %v656_v4 }
 0x2f3   : > { %v1139_v8 = vpop.eup %1138 }
 0x2f4   : > { %v768_v9 = vsel %vm376_vm2, %v1139_v8, 0.0 }
 0x2f6   : > { %550 = vrot.lane.b32.xlu1 %v1259_v10, %s1167_s26  ;;  %s300_s26 = scalar_lea.vmem %s1359_s8, %s996_s11 }
 0x303   : > { %437 = vrot.lane.b32.xlu0 %v1259_v10, %s1168_s29 }
 0x307   : > { %774 = vrot.lane.b32.xlu0 %v1259_v10, %s1169_s30 }
 0x31a   : > { %769 = vadd.xlane.f32.xlu1 %v768_v9 }
 0x32b   : > { %662 = vrot.lane.b32.xlu1 %v1259_v10, %s1170_s9 }
 0x36a   : > { %v433_v11 = vpop.xlane.xlu0 %432 }
 0x36b   : > { %1140 = vrcp.f32 %v433_v11 }
 0x372   : > { %v546_v12 = vpop.xlane.xlu1 %545 }
 0x373   : > { %1142 = vrcp.f32 %v546_v12 }
 0x375   : > { %v1141_v13 = vpop.eup %1140 }
 0x376   : > { %v435_v15 = vmul.f32 %v1141_v13, %v1133_v58  ;;  %v551_v18 = vpop.permute.xlu1 %550  ;;  %v1010_v58 = vld [vmem:[%s1355_s4] ss:$0 sm:$0xff] }
 0x377   : > { %v556_v21 = vsel %vm442_vm3, %v551_v18, 0 }
 0x378   : > { %v436_v19 = vpack.c.bf16 %v435_v15, %v435_v15  ;;  %v1015_v15 = vld [vmem:[%s1358_s7] ss:$0 sm:$0xff] }
 0x37a   : > { %v658_v14 = vpop.xlane.xlu0 %657 }
 0x37b   : > { %1144 = vrcp.f32 %v658_v14 }
 0x37d   : > { %v1143_v20 = vpop.eup %1142 }
 0x37e   : > { %v438_v16 = vpop.permute.xlu0 %437  ;;  %v548_v10 = vmul.f32 %v1143_v20, %v1135_v63 }
 0x37f   : > { %v444_v17 = vsel %vm442_vm3, %v438_v16, 0 }
 0x380   : > { %1055 = vmatpush3.bf16.msra.mxu0 %v444_v17  ;;  %v549_v22 = vpack.c.bf16 %v548_v10, %v548_v10 }
 0x381   : > { %1066 = vmatprep.subr.bf16.mxu0 %v1158_v1 }
 0x382   : > { %v775_v28 = vpop.permute.xlu0 %774 }
 0x383   : > { %1057 = vmatmul.mubr.msk.bf16.vlgmr.msra.gmra.mrb[4].mxu0 %vm376_vm2, %v436_v19  ;;  %v780_v30 = vsel %vm442_vm3, %v775_v28, 0 }
 0x384   : > { %1067 = vmatpush3.bf16.msra.mxu0 %v556_v21  ;;  %1068 = vmatprep.mubr.msk.bf16.mxu0 %vm1159_vm0, %v1158_v1 }
 0x385   : > { %1078 = vmatprep.subr.bf16.mxu0 %v1158_v1  ;;  %v1145_v23 = vpop.eup %1144 }
 0x386   : > { %v660_v25 = vmul.f32 %v1145_v23, %v1137_v2 }
 0x388   : > { %v661_v29 = vpack.c.bf16 %v660_v25, %v660_v25 }
 0x38b   : > { %1069 = vmatmul.mubr.msk.bf16.vlgmr.msra.gmra.mrb[8].mxu0 %vm376_vm2, %v549_v22 }
 0x38c   : > { %1080 = vmatprep.mubr.msk.bf16.mxu0 %vm1159_vm0, %v1158_v1 }
 0x3a7   : > { %v770_v24 = vpop.xlane.xlu1 %769 }
 0x3a8   : > { %1146 = vrcp.f32 %v770_v24 }
 0x3ab   : > { %v663_v26 = vpop.permute.xlu1 %662 }
 0x3ac   : > { %v668_v27 = vsel %vm442_vm3, %v663_v26, 0 }
 0x3ad   : > { %1079 = vmatpush3.bf16.msra.mxu0 %v668_v27 }
 0x3ae   : > { %1090 = vmatprep.subr.bf16.mxu0 %v1158_v1 }
 0x3b0   : > { %1081 = vmatmul.mubr.msk.bf16.vlgmr.msra.gmra.mrb[12].mxu0 %vm376_vm2, %v661_v29 }
 0x3b1   : > { %1091 = vmatpush3.bf16.msra.mxu0 %v780_v30  ;;  %1092 = vmatprep.mubr.msk.bf16.mxu0 %vm1159_vm0, %v1158_v1 }
 0x3b2   : > { %v1147_v31 = vpop.eup %1146 }
 0x3b3   : > { %v772_v32 = vmul.f32 %v1147_v31, %v1139_v8 }
 0x3b5   : > { %v773_v33 = vpack.c.bf16 %v772_v32, %v772_v32 }
 0x3b8   : > { %1093 = vmatmul.mubr.msk.bf16.vlgmr.msra.gmra.mrb[16].mxu0 %vm376_vm2, %v773_v33 }
 0x456   : > { %v480_v34 = vpop.f32.mrb[4].mxu0 }
 0x457   : > { %v1058_v35 = vpop.f32.mrb[5].mxu0 }
 0x458   : > { %v483_v36 = vpop.f32.mrb[6].mxu0 }
 0x459   : > { %v1059_v37 = vpop.f32.mrb[7].mxu0 }
 0x45e   : > { %v592_v38 = vpop.f32.mrb[8].mxu0 }
 0x45f   : > { %823 = vrot.lane.b32.xlu1 %v592_v38, %s1171_s10  ;;  %v1070_v39 = vpop.f32.mrb[9].mxu0 }
 0x460   : > { %v595_v40 = vpop.f32.mrb[10].mxu0 }
 0x461   : > { %v1071_v41 = vpop.f32.mrb[11].mxu0 }
 0x483   : > { %v704_v44 = vpop.f32.mrb[12].mxu0 }
 0x484   : > { %827 = vrot.lane.b32.xlu0 %v704_v44, %s1172_s16  ;;  %v1082_v45 = vpop.f32.mrb[13].mxu0 }
 0x485   : > { %v707_v46 = vpop.f32.mrb[14].mxu0 }
 0x486   : > { %v1083_v47 = vpop.f32.mrb[15].mxu0 }
 0x48b   : > { %v816_v48 = vpop.f32.mrb[16].mxu0 }
 0x48c   : > { %831 = vrot.lane.b32.xlu1 %v816_v48, %s1173_s17  ;;  %v1094_v49 = vpop.f32.mrb[17].mxu0 }
 0x48d   : > { %v819_v50 = vpop.f32.mrb[18].mxu0 }
 0x48e   : > { %v1095_v51 = vpop.f32.mrb[19].mxu0 }
 0x4d1   : > { %v824_v52 = vpop.permute.xlu1 %823 }
 0x4d2   : > { %v834_v53 = vsel %vm376_vm2, %v480_v34, %v824_v52 }
 0x4f6   : > { %v828_v1 = vpop.permute.xlu0 %827 }
 0x4f7   : > { %v836_v54 = vsel %vm835_vm4, %v834_v53, %v828_v1 }
 0x4fe   : > { %v832_v55 = vpop.permute.xlu1 %831 }
 0x4ff   : > { %v838_v56 = vsel %vm837_vm5, %v836_v54, %v832_v55 }
 0x500   : > { %v839_v57 = vpack.c.bf16 %v838_v56, %v838_v56 }
 0x502   : > { %1101 = vmatmul.mubr.msk.bf16.vlgmr.msra.gmra.mrb[16].mxu1 %vm327_vm1, %v839_v57 }
 0x5d5   : > { %v900_v59 = vpop.f32.mrb[16].mxu1 }
 0x5d6   : > { %v901_v60 = vadd.f32 %v1010_v58, %v900_v59  ;;  %v1102_v61 = vpop.f32.mrb[17].mxu1 }
 0x5d7   : > { %v903_v62 = vpop.f32.mrb[18].mxu1 }
 0x5d8   : > { %v1103_v63 = vpop.f32.mrb[19].mxu1  ;;  %v908_v0 = vadd.f32 %v901_v60, %v1249_v3  ;;  %v1014_v3 = vld [vmem:[%s1357_s6] ss:$0 sm:$0xff] }
 0x5da   : > { %v909_v2 = vsel %vm327_vm1, %v908_v0, 0.0 }
 0x5db   : > { %910 = vadd.xlane.f32.xlu0 %v909_v2 }
 0x668   : > { %v911_v4 = vpop.xlane.xlu0 %910 }
 0x669   : > { %v913_v5 = vmul.f32 0.03125, %v911_v4 }
 0x66b   : > { %v914_v6 = vsub.f32 %v908_v0, %v913_v5 }
 0x66d   : > { %v915_v7 = vmul.f32 %v914_v6, %v914_v6 }
 0x66f   : > { %v916_v8 = vsel %vm327_vm1, %v915_v7, 0.0 }
 0x670   : > { %917 = vadd.xlane.f32.xlu1 %v916_v8 }
 0x6fd   : > { %v918_v9 = vpop.xlane.xlu1 %917 }
 0x6fe   : > { %v919_v11 = vmul.f32 0.03125, %v918_v9 }
 0x700   : > { %v920_v12 = vadd.f32 1e-05, %v919_v11 }
 0x702   : > { %1148 = vrsqrt.f32 %v920_v12 }
 0x70c   : > { %v1149_v13 = vpop.eup %1148 }
 0x70d   : > { %v922_v14 = vmul.f32 %v1149_v13, %v914_v6 }
 0x70f   : > { %v929_v16 = vmul.f32 %v1014_v3, %v922_v14 }
 0x711   : > { %v936_v17 = vadd.f32 %v1015_v15, %v929_v16 }
 0x713   : > { %937 = vst.msk [vmem:[%s300_s26] sm:$0xff] %vm327_vm1, %v936_v17 }
 0x714 PF: > { %s18_s27 = sadd.s32 1, %s1156_s27  }
 0x715   : > { %p15_p4 = scmp.ge.s32.totalorder %s18_s27, 4  }
 0x717   :  { %17 = sbr.rel (!%p15_p4) target bundleno = 1 (0x1), region = 82 }

// kernel: transformer_decoder.13
= control target key start
LH: loop header
LB: loop body
LE: loop exit
PB: predicated region body
PF: predicated region fallthrough
CT: control target
= control target key end

     0   :  { %12 = vsyncpa [#allocation3], 0  ;;  %s874_s0 = inlined_call_operand.vmem [shape: f32[2,8,32], index: 0, kind: input, shape index: {}]   ;;  %s875_s1 = inlined_call_operand.vmem [shape: bf16[32,64], index: 1, kind: input, shape index: {}]   ;;  %s876_s2 = inlined_call_operand.vmem [shape: f32[1,64], index: 2, kind: input, shape index: {}]   ;;  %s877_s3 = inlined_call_operand.vmem [shape: bf16[64,32], index: 3, kind: input, shape index: {}]   ;;  %s878_s4 = inlined_call_operand.vmem [shape: f32[1,32], index: 4, kind: input, shape index: {}]   ;;  %s879_s5 = inlined_call_operand.vmem [shape: f32[1,32], index: 5, kind: input, shape index: {}]   ;;  %s880_s6 = inlined_call_operand.vmem [shape: f32[1,32], index: 6, kind: input, shape index: {}]   ;;  %s881_s7 = inlined_call_operand.hbm [shape: f32[2,8,32], index: 7, kind: output, shape index: {}]  }
   0x1   :  { %14 = vsyncpa [#allocation3 + $0x1], 0  ;;  %s740_s24 = smov 0   ;;  %s742_s25 = smov 0  }
   0x2   :  { %s744_s26 = smov 0   ;;  %s746_s27 = smov 0  }
   0x3 LB: > { %s761_s28 = sadd.s32 4294967295, %s695_s27   ;;  %s534_s29 = sadd.s32 4294967294, %s695_s27   ;;  %s695_s27 = sphi %s746_s27, %s887_s27   ;;  %s691_s26 = sphi %s744_s26, %s886_s26   ;;  %s687_s25 = sphi %s742_s25, %s885_s25   ;;  %s683_s24 = sphi %s740_s24, %s884_s24  }
   0x4   : > { %s765_s30 = sadd.s32 1, %s695_s27   ;;  %s179_s8 = sadd.s32 1, %s691_s26 }
   0x5   : > { %s176_s9 = ssub.s32 %s695_s27, %s765_s30  ;;  %p189_p0 = scmp.ne.s32.totalorder %s691_s26, %s687_s25 }
   0x6   : > { %p177_p1 = scmp.eq.s32.totalorder %s176_s9, 0  ;;  %p190_p2 = scmp.eq.s32.totalorder %s761_s28, 1 }
   0x7   : > { %p195_p3 = scmp.ne.s32.totalorder %s687_s25, %s683_s24  ;;  %p196_p4 = scmp.eq.s32.totalorder %s534_s29, 1 }
   0x8   : > { %s776_s10 = scalar_select %p177_p1, %s691_s26, %s179_s8  }
   0x9   : > { %p778_p5 = por %p190_p2, %p189_p0  ;;  %p782_p6 = por %p196_p4, %p195_p3 }
   0xa   : > { %p537_p7 = scmp.ge.s32.totalorder %s695_s27, 1  ;;  %p239_p8 = scmp.lt.s32.totalorder %s695_s27, 3 }
   0xc   : > { %p240_p9 = pnand %p537_p7, %p239_p8 }
   0xd   : > { %v625_v0 = vld [vmem:[%s875_s1] sm:$0xff] (!%p240_p9)   ;;  %v697_v1 = vmov (!%p240_p9), 0.0   ;;  %v626_v2 = vld [vmem:[%s875_s1 + $0x8] sm:$0xff] (!%p240_p9)   ;;  %vm698_vm0 = vmmov (!%p240_p9), 0   ;;  %p270_p10 = scmp.lt.s32.totalorder (!%p240_p9), %s761_s28, 1  ;;  %vm300_vm1 = vcmask (!%p240_p9), 261120  }
   0xe   : > { %243 = sbr.rel (%p240_p9) target bundleno = 789 (0x315), region = 48  ;;  %564 = vmatprep.subr.bf16.mxu0 (!%p240_p9), %v697_v1  ;;  %572 = vmatprep.subr.bf16.mxu1 (!%p240_p9), %v697_v1  ;;  %v627_v3 = vld [vmem:[%s877_s3] sm:$0xff] (!%p240_p9)   ;;  %v628_v4 = vld [vmem:[%s877_s3 + $0x8] sm:$0xff] (!%p240_p9)   ;;  %v629_v7 = vld [vmem:[%s877_s3 + $0x10] sm:$0xff] (!%p240_p9)   ;;  %vm385_vm2 = vcmask (!%p240_p9), 523264   ;;  %s267_s20 = sand.u32 (!%p240_p9), 1, %s687_s25  }
   0xf   : > { %565 = vmatpush3.bf16.msra.mxu0 (!%p240_p9), %v625_v0  ;;  %568 = vmatprep.mubr.msk.bf16.mxu0 (!%p240_p9), %vm698_vm0, %v697_v1  ;;  %v630_v8 = vld [vmem:[%s877_s3 + $0x18] sm:$0xff] (!%p240_p9)   ;;  %v540_v9 = vld [vmem:[%s876_s2] ss:$0 sm:$0xff] (!%p240_p9)  ;;  %s538_s21 = sshll.u32 (!%p240_p9), %s267_s20, 3  ;;  %s553_s9 = sshll.u32 (!%p240_p9), %s761_s28, 7 }
  0x10   : > { %566 = vmatprep.subr.bf16.mxu0 (!%p240_p9), %v697_v1  ;;  %580 = vmatprep.mubr.msk.bf16.mxu1 (!%p240_p9), %vm698_vm0, %v697_v1  ;;  %v544_v17 = vld [vmem:[%s878_s4] ss:$0 sm:$0xff] (!%p240_p9)  ;;  %s269_s13 = scalar_lea.vmem (!%p240_p9), [#allocation2], %s538_s21  ;;  %s831_s17 = scalar_lea.hbm (!%p240_p9), %s881_s7, %s553_s9 }
  0x11   : > { %573 = vmatpush3.bf16.msra.mxu1 (!%p240_p9), %v627_v3  ;;  %v550_v34 = vld [vmem:[%s879_s5] ss:$0 sm:$0xff] (!%p240_p9)  ;;  %s475_s14 = sshll.u32 (!%p240_p9), %s269_s13, 4  ;;  %s462_s18 = scalar_lea.sflag (!%p240_p9), [#allocation3], %s267_s20  ;;  %s833_s14 = int_to_ptr.vmem [resolvable:$true] %s475_s14 }
  0x12   : > { %574 = vmatprep.subr.bf16.mxu1 (!%p240_p9), %v697_v1  ;;  %v551_v36 = vld [vmem:[%s880_s6] ss:$0 sm:$0xff] (!%p240_p9) }
  0x13   : > { %567 = vmatpush3.bf16.msra.mxu0 (!%p240_p9), %v626_v2 }
  0x15   : > { %s271_s19 = scalar_select %p270_p10, %s761_s28, 1  ;;  %575 = vmatpush3.bf16.msra.mxu1 %v628_v4 }
  0x16   : > { %576 = vmatprep.subr.bf16.mxu1 %v697_v1  ;;  %s699_s28 = smov [#allocation2]  }
  0x17   : > { %s539_s22 = sshll.u32 %s271_s19, 3  ;;  %s633_s19 = scalar_lea.vmem %s833_s14, 128 }
  0x18   : > { %s273_s8 = scalar_lea.vmem %s874_s0, %s539_s22  ;;  %p634_p11 = scmp.ne.s32.totalorder %s833_s14, %s633_s19 }
  0x19   : > { %v275_v5 = vld [vmem:[%s273_s8] sm:$0xff]  ;;  %577 = vmatpush3.bf16.msra.mxu1 %v629_v7  ;;  %s637_s21 = sshll.u32 %s699_s28, 4  ;;  %s638_s21 = int_to_ptr.vmem [resolvable:$false] %s637_s21 }
  0x1a   : > { %v276_v6 = vpack.c.bf16 %v275_v5, %v275_v5  ;;  %578 = vmatprep.subr.bf16.mxu1 %v697_v1  ;;  %p635_p12 = pnand %p634_p11, %p778_p5  ;;  %s639_s22 = scalar_lea.vmem %s638_s21, 256 }
  0x1b   : > { %p640_p0 = scmp.lt.s32.totalorder %s833_s14, %s638_s21  ;;  %p641_p1 = scmp.lt.s32.totalorder %s639_s22, %s633_s19 }
  0x1c   : > { %569 = vmatmul.mubr.msk.bf16.vlgmr.msra.gmra.mrb[0].mxu0 %vm300_vm1, %v276_v6  ;;  %p636_p13 = pneg %p635_p12 }
  0x1d   : > { %579 = vmatpush3.bf16.msra.mxu1 %v630_v8  ;;  %p642_p2 = por %p641_p1, %p640_p0 }
  0x1f   : > { %p643_p3 = pnand %p642_p2, %p636_p13 }
  0xef   : > { %v338_v10 = vpop.f32.mrb[0].mxu0 }
  0xf0   : > { %v339_v11 = vadd.f32 %v540_v9, %v338_v10  ;;  %v570_v12 = vpop.f32.mrb[1].mxu0 }
  0xf1   : > { %v341_v13 = vpop.f32.mrb[2].mxu0 }
  0xf2   : > { %v344_v14 = vmax.f32 %v339_v11, 0.0  ;;  %v571_v15 = vpop.f32.mrb[3].mxu0 }
  0xf4   : > { %v345_v16 = vpack.c.bf16 %v344_v14, %v344_v14 }
  0xf6   : > { %581 = vmatmul.mubr.msk.bf16.vlgmr.msra.gmra.mrb[0].mxu1 %vm385_vm2, %v345_v16 }
 0x1c9   : > { %v423_v18 = vpop.f32.mrb[0].mxu1 }
 0x1ca   : > { %v424_v19 = vadd.f32 %v544_v17, %v423_v18  ;;  %v582_v20 = vpop.f32.mrb[1].mxu1 }
 0x1cb   : > { %v426_v21 = vpop.f32.mrb[2].mxu1 }
 0x1cc   : > { %v583_v22 = vpop.f32.mrb[3].mxu1  ;;  %v431_v23 = vadd.f32 %v424_v19, %v275_v5 }
 0x1ce   : > { %v432_v24 = vsel %vm300_vm1, %v431_v23, 0.0 }
 0x1cf   : > { %433 = vadd.xlane.f32.xlu0 %v432_v24 }
 0x25c   : > { %v434_v25 = vpop.xlane.xlu0 %433 }
 0x25d   : > { %v436_v26 = vmul.f32 0.03125, %v434_v25 }
 0x25f   : > { %v437_v27 = vsub.f32 %v431_v23, %v436_v26 }
 0x261   : > { %v438_v28 = vmul.f32 %v437_v27, %v437_v27 }
 0x263   : > { %v439_v29 = vsel %vm300_vm1, %v438_v28, 0.0 }
 0x264   : > { %440 = vadd.xlane.f32.xlu0 %v439_v29 }
 0x2f1   : > { %v441_v30 = vpop.xlane.xlu0 %440 }
 0x2f2   : > { %v442_v31 = vmul.f32 0.03125, %v441_v30 }
 0x2f4   : > { %v443_v32 = vadd.f32 1e-05, %v442_v31 }
 0x2f6   : > { %631 = vrsqrt.f32 %v443_v32 }
 0x300   : > { %v632_v33 = vpop.eup %631 }
 0x301   : > { %v445_v35 = vmul.f32 %v632_v33, %v437_v27 }
 0x303   : > { %v452_v37 = vmul.f32 %v550_v34, %v445_v35 }
 0x305   : > { %v459_v38 = vadd.f32 %v551_v36, %v452_v37 }
 0x307   : > { %460 = vst.msk [vmem:[%s269_s13] sm:$0xff] %vm300_vm1, %v459_v38 }
 0x308   : > { %646 = shalt.err (!%p643_p3)
}
 0x309   : > { %s647_s20 = scalar_lea.hbm %s831_s17, 128  ;;  %s651_s8 = scalar_lea.hbm %s881_s7, 256 }
 0x30a   : > { %p648_p4 = scmp.ne.s32.totalorder %s831_s17, %s647_s20  ;;  %p652_p9 = scmp.lt.u32.totalorder %s831_s17, %s881_s7 }
 0x30b   : > { %p653_p10 = scmp.lt.u32.totalorder %s651_s8, %s647_s20  ;;  %p655_p12 = scmp.lt.u32.totalorder %s647_s20, %s831_s17 }
 0x30c   : > { %p649_p7 = pnand %p648_p4, %p778_p5 }
 0x30d   : > { %p654_p11 = por %p653_p10, %p652_p9 }
 0x30e   : > { %p650_p8 = pneg %p649_p7 }
 0x30f   : > { %p656_p13 = por %p655_p12, %p654_p11 }
 0x311   : > { %p657_p0 = pnand %p656_p13, %p650_p8 }
 0x313   : > { %660 = shalt.err (!%p657_p0)
}
 0x314   : > { %584 = dma.vmem_to_hbm [thread:$0]  (%p778_p5), %s833_s14, 128, %s831_s17, %s462_s18  }
 0x315 PF: > { %p590_p1 = scmp.ge.s32.totalorder %s695_s27, 2  ;;  %s487_s15 = sand.u32 1, %s683_s24  }
 0x316   : > { %s488_s16 = scalar_lea.sflag [#allocation3], %s487_s15 }
 0x317   : > { %p587_p2 = pnand %p590_p1, %p782_p6 }
 0x319   : > { %678 = dma.done.wait (!%p587_p2), %s488_s16, 128  }
 0x31a   : > { %680 = vsyncadd (!%p587_p2), %s488_s16, 4294967168  ;;  %p17_p3 = scmp.ge.s32.totalorder %s765_s30, 4   ;;  %s884_s24 = smov %s687_s25 }
 0x31b   : > { %s885_s25 = smov %s691_s26  ;;  %s886_s26 = smov %s776_s10 }
 0x31c   : > { %s887_s27 = smov %s765_s30  ;;  %19 = sbr.rel (!%p17_p3) target bundleno = 3 (0x3), region = 83 }
 0x323   :  { %493 = vsyncpa [#allocation3], 1 }
 0x324   :  { %495 = vsyncpa [#allocation3 + $0x1], 1 }

</bundles_post_ra>
